<compile_context>
chip_gen: v7x
topology: tpu7x:2x2x1
jax: 0.10.0
libtpu: 0.0.40
codegen_flags: <defaults>
</compile_context>

<pallas_src>
import functools
import math

import jax
import jax.numpy as jnp
from jax.experimental import pallas as pl
from jax.experimental.pallas import tpu as pltpu

_LN_EPS = 1e-5


# ---------------------------------------------------------------------------
# Tile selection helpers.
# ---------------------------------------------------------------------------
def _row_tile(m: int) -> int:
    # Largest row tile (multiple of 8, capped at 256 for v7x's 64 MiB VMEM)
    # that divides m while leaving >=2 grid steps so both v7x TensorCores
    # receive work on the "parallel" axis.
    for t in (256, 128, 64, 32, 16, 8):
        if m % t == 0 and m // t >= 2:
            return t
    return m


def _col_tile(n: int) -> int:
    # Lane-dense output tiles, multiples of 128 (full MXU N on v6e/v7x at 256+).
    for t in (512, 256, 128):
        if n % t == 0:
            return t
    return n


# ---------------------------------------------------------------------------
# Fused linear kernel: y = x @ w + b, tiled over (M, N).  Used only for the
# Q/K/V projections (K = d_model, so the x-block and weight-column-block fit
# comfortably in VMEM without K tiling).
# ---------------------------------------------------------------------------
def _linear_kernel(x_ref, w_ref, b_ref, o_ref):
    y = jnp.dot(x_ref[...], w_ref[...], preferred_element_type=jnp.float32)
    o_ref[...] = (y + b_ref[...]).astype(o_ref.dtype)


def linear(x2d, w, b):
    M, K = x2d.shape
    N = w.shape[1]
    tm, tn = _row_tile(M), _col_tile(N)
    return pl.pallas_call(
        _linear_kernel,
        out_shape=jax.ShapeDtypeStruct((M, N), x2d.dtype),
        grid_spec=pltpu.PrefetchScalarGridSpec(
            num_scalar_prefetch=0,
            grid=(M // tm, N // tn),
            in_specs=[
                pl.BlockSpec((tm, K), lambda i, j: (i, 0)),
                pl.BlockSpec((K, tn), lambda i, j: (0, j)),
                pl.BlockSpec((1, tn), lambda i, j: (0, j)),
            ],
            out_specs=pl.BlockSpec((tm, tn), lambda i, j: (i, j)),
        ),
        compiler_params=pltpu.CompilerParams(
            dimension_semantics=("parallel", "parallel")),
    )(x2d, w, b.reshape(1, N))


# ---------------------------------------------------------------------------
# Attention kernels.  One batch element per grid step; all heads handled
# inside the kernel via static column slices, so no (B,H,S,Dh) transpose glue
# is needed and the output slab (Sq, D) is lane-dense.
# ---------------------------------------------------------------------------
def _attn_heads(q, k, v, o_ref, *, num_heads, scale, causal):
    sq, d = q.shape
    sk = k.shape[0]
    dh = d // num_heads
    if causal:
        row = jax.lax.broadcasted_iota(jnp.int32, (sq, sk), 0)
        col = jax.lax.broadcasted_iota(jnp.int32, (sq, sk), 1)
        masked = col > row        # torch: masked_fill(mask == 0, -1e9)
    for h in range(num_heads):
        lo, hi = h * dh, (h + 1) * dh
        qh = q[:, lo:hi] * scale
        s = jax.lax.dot_general(qh, k[:, lo:hi], (((1,), (1,)), ((), ())),
                                preferred_element_type=jnp.float32)
        if causal:
            s = jnp.where(masked, -1e9, s)
        m = jnp.max(s, axis=-1, keepdims=True)
        p = jnp.exp(s - m)
        l = jnp.sum(p, axis=-1, keepdims=True)
        ctx = jnp.dot(p, v[:, lo:hi], preferred_element_type=jnp.float32)
        ctx = ctx * pl.reciprocal(l, approx=True)
        o_ref[:, lo:hi] = ctx.astype(o_ref.dtype)


def _self_attn_kernel(qkv_ref, o_ref, *, num_heads, scale, causal):
    qkv = qkv_ref[...].astype(jnp.float32)      # (Sq, 3D)
    d = qkv.shape[1] // 3
    _attn_heads(qkv[:, :d], qkv[:, d:2 * d], qkv[:, 2 * d:], o_ref,
                num_heads=num_heads, scale=scale, causal=causal)


def _cross_attn_kernel(q_ref, kv_ref, o_ref, *, num_heads, scale):
    q = q_ref[...].astype(jnp.float32)          # (Sq, D)
    kv = kv_ref[...].astype(jnp.float32)        # (Sk, 2D)
    d = q.shape[1]
    _attn_heads(q, kv[:, :d], kv[:, d:], o_ref,
                num_heads=num_heads, scale=scale, causal=False)


def attention_self(qkv, *, num_heads, causal):
    B, Sq, D3 = qkv.shape
    D = D3 // 3
    scale = 1.0 / math.sqrt(D // num_heads)
    return pl.pallas_call(
        functools.partial(_self_attn_kernel, num_heads=num_heads,
                          scale=scale, causal=causal),
        out_shape=jax.ShapeDtypeStruct((B, Sq, D), qkv.dtype),
        grid_spec=pltpu.PrefetchScalarGridSpec(
            num_scalar_prefetch=0,
            grid=(B,),
            in_specs=[pl.BlockSpec((None, Sq, D3), lambda b: (b, 0, 0))],
            out_specs=pl.BlockSpec((None, Sq, D), lambda b: (b, 0, 0)),
        ),
        compiler_params=pltpu.CompilerParams(dimension_semantics=("parallel",)),
    )(qkv)


def attention_cross(q, kv, *, num_heads):
    B, Sq, D = q.shape
    Sk = kv.shape[1]
    scale = 1.0 / math.sqrt(D // num_heads)
    return pl.pallas_call(
        functools.partial(_cross_attn_kernel, num_heads=num_heads, scale=scale),
        out_shape=jax.ShapeDtypeStruct((B, Sq, D), q.dtype),
        grid_spec=pltpu.PrefetchScalarGridSpec(
            num_scalar_prefetch=0,
            grid=(B,),
            in_specs=[
                pl.BlockSpec((None, Sq, D), lambda b: (b, 0, 0)),
                pl.BlockSpec((None, Sk, 2 * D), lambda b: (b, 0, 0)),
            ],
            out_specs=pl.BlockSpec((None, Sq, D), lambda b: (b, 0, 0)),
        ),
        compiler_params=pltpu.CompilerParams(dimension_semantics=("parallel",)),
    )(q, kv)


# ---------------------------------------------------------------------------
# Fused output-projection + residual-add + LayerNorm kernel:
#   out = LN(res + ctx @ wo + bo)
# ---------------------------------------------------------------------------
def _proj_add_ln_kernel(ctx_ref, res_ref, w_ref, b_ref, g_ref, bt_ref, o_ref,
                        *, eps):
    y = jnp.dot(ctx_ref[...], w_ref[...], preferred_element_type=jnp.float32)
    z = y + b_ref[...] + res_ref[...].astype(jnp.float32)
    mu = jnp.mean(z, axis=-1, keepdims=True)
    d = z - mu
    var = jnp.mean(d * d, axis=-1, keepdims=True)
    zn = d * jax.lax.rsqrt(var + eps)
    o_ref[...] = (zn * g_ref[...] + bt_ref[...]).astype(o_ref.dtype)


def proj_add_layernorm(ctx2d, res2d, w, b, gamma, beta, eps=_LN_EPS):
    M, K = ctx2d.shape
    D = res2d.shape[1]
    tm = _row_tile(M)
    return pl.pallas_call(
        functools.partial(_proj_add_ln_kernel, eps=eps),
        out_shape=jax.ShapeDtypeStruct((M, D), res2d.dtype),
        grid_spec=pltpu.PrefetchScalarGridSpec(
            num_scalar_prefetch=0,
            grid=(M // tm,),
            in_specs=[
                pl.BlockSpec((tm, K), lambda i: (i, 0)),
                pl.BlockSpec((tm, D), lambda i: (i, 0)),
                pl.BlockSpec((K, D), lambda i: (0, 0)),   # wo stays resident
                pl.BlockSpec((1, D), lambda i: (0, 0)),
                pl.BlockSpec((1, D), lambda i: (0, 0)),
                pl.BlockSpec((1, D), lambda i: (0, 0)),
            ],
            out_specs=pl.BlockSpec((tm, D), lambda i: (i, 0)),
        ),
        compiler_params=pltpu.CompilerParams(dimension_semantics=("parallel",)),
    )(ctx2d, res2d, w, b.reshape(1, D), gamma.reshape(1, D), beta.reshape(1, D))


# ---------------------------------------------------------------------------
# Fused FFN + residual + LayerNorm kernel:
#   out = LN(x + relu(x @ w1 + b1) @ w2 + b2)
# d_ff is tiled as a reduction axis; the (tm, tf) hidden activation never
# leaves VMEM and the per-tile partial products accumulate in f32 scratch.
# ---------------------------------------------------------------------------
def _ffn_add_ln_kernel(x_ref, w1_ref, b1_ref, w2_ref, b2_ref, g_ref, bt_ref,
                       o_ref, acc_ref, *, eps):
    f = pl.program_id(1)

    @pl.when(f == 0)
    def _():
        acc_ref[...] = jnp.zeros_like(acc_ref)

    x = x_ref[...]
    h = jnp.dot(x, w1_ref[...], preferred_element_type=jnp.float32) + b1_ref[...]
    h = jnp.maximum(h, 0.0)
    acc_ref[...] += jnp.dot(h.astype(x.dtype), w2_ref[...],
                            preferred_element_type=jnp.float32)

    @pl.when(f == pl.num_programs(1) - 1)
    def _():
        z = acc_ref[...] + b2_ref[...] + x.astype(jnp.float32)
        mu = jnp.mean(z, axis=-1, keepdims=True)
        d = z - mu
        var = jnp.mean(d * d, axis=-1, keepdims=True)
        zn = d * jax.lax.rsqrt(var + eps)
        o_ref[...] = (zn * g_ref[...] + bt_ref[...]).astype(o_ref.dtype)


def _ff_tile(f: int) -> int:
    for t in (512, 256, 128):
        if f % t == 0:
            return t
    return f


def ffn_add_layernorm(x2d, w1, b1, w2, b2, gamma, beta, eps=_LN_EPS):
    M, D = x2d.shape
    F = w1.shape[1]
    tm, tf = _row_tile(M), _ff_tile(F)
    return pl.pallas_call(
        functools.partial(_ffn_add_ln_kernel, eps=eps),
        out_shape=jax.ShapeDtypeStruct((M, D), x2d.dtype),
        grid_spec=pltpu.PrefetchScalarGridSpec(
            num_scalar_prefetch=0,
            grid=(M // tm, F // tf),
            in_specs=[
                pl.BlockSpec((tm, D), lambda i, f: (i, 0)),
                pl.BlockSpec((D, tf), lambda i, f: (0, f)),
                pl.BlockSpec((1, tf), lambda i, f: (0, f)),
                pl.BlockSpec((tf, D), lambda i, f: (f, 0)),
                pl.BlockSpec((1, D), lambda i, f: (0, 0)),
                pl.BlockSpec((1, D), lambda i, f: (0, 0)),
                pl.BlockSpec((1, D), lambda i, f: (0, 0)),
            ],
            out_specs=pl.BlockSpec((tm, D), lambda i, f: (i, 0)),
            scratch_shapes=[pltpu.VMEM((tm, D), jnp.float32)],
        ),
        compiler_params=pltpu.CompilerParams(
            dimension_semantics=("parallel", "arbitrary")),
    )(x2d, w1, b1.reshape(1, F), w2, b2.reshape(1, D),
      gamma.reshape(1, D), beta.reshape(1, D))


# ---------------------------------------------------------------------------
# Full TransformerDecoder forward (stack of decoder layers).
# TODO(synk): nn.Dropout layers are identity here (inference / eval mode).
# TODO(synk): only "causal" / "no mask" are supported (matches the common
#             decoder usage); arbitrary boolean masks would need a bias input.
# ---------------------------------------------------------------------------
@functools.partial(jax.jit, static_argnames=("num_heads", "causal_tgt"))
def transformer_decoder_forward(x, enc_output, params, *, num_heads,
                                causal_tgt=True):
    B, St, D = x.shape
    Ss = enc_output.shape[1]
    enc2d = enc_output.reshape(B * Ss, D)
    x2d = x.reshape(B * St, D)

    for lp in params:
        # --- self-attention sublayer (fused QKV projection, pre-fused weights)
        sa = lp["self_attn"]
        qkv = linear(x2d, sa["wqkv"], sa["bqkv"])                 # (M, 3D)
        ctx = attention_self(qkv.reshape(B, St, 3 * D),
                             num_heads=num_heads, causal=causal_tgt)
        x2d = proj_add_layernorm(ctx.reshape(B * St, D), x2d,
                                 sa["wo"], sa["bo"],
                                 lp["ln1_g"], lp["ln1_b"])

        # --- cross-attention sublayer (Q from decoder stream, fused K/V) ---
        ca = lp["cross_attn"]
        q = linear(x2d, ca["wq"], ca["bq"])                        # (M, D)
        kv = linear(enc2d, ca["wkv"], ca["bkv"])                   # (Me, 2D)
        ctx = attention_cross(q.reshape(B, St, D),
                              kv.reshape(B, Ss, 2 * D),
                              num_heads=num_heads)
        x2d = proj_add_layernorm(ctx.reshape(B * St, D), x2d,
                                 ca["wo"], ca["bo"],
                                 lp["ln2_g"], lp["ln2_b"])

        # --- feed-forward sublayer (FF1+ReLU+FF2+residual+LN fused) ---
        x2d = ffn_add_layernorm(x2d, lp["ff_w1"], lp["ff_b1"],
                                lp["ff_w2"], lp["ff_b2"],
                                lp["ln3_g"], lp["ln3_b"])

    return x2d.reshape(B, St, D)


# ---------------------------------------------------------------------------
# Parameter init (deterministic, PyTorch-style uniform fan-in scaling).
# Weights stored (in, out); Q/K/V (and K/V) weights are pre-fused at init so
# no concatenation happens per forward pass.
# ---------------------------------------------------------------------------
def _init_linear(key, d_in, d_out):
    kw, kb = jax.random.split(key)
    bound = 1.0 / math.sqrt(d_in)
    w = jax.random.uniform(kw, (d_in, d_out), jnp.float32, -bound, bound)
    b = jax.random.uniform(kb, (d_out,), jnp.float32, -bound, bound)
    return w, b


def _init_self_mha(key, d_model):
    ks = jax.random.split(key, 4)
    wq, bq = _init_linear(ks[0], d_model, d_model)
    wk, bk = _init_linear(ks[1], d_model, d_model)
    wv, bv = _init_linear(ks[2], d_model, d_model)
    wo, bo = _init_linear(ks[3], d_model, d_model)
    return dict(wqkv=jnp.concatenate([wq, wk, wv], axis=1),
                bqkv=jnp.concatenate([bq, bk, bv], axis=0),
                wo=wo, bo=bo)


def _init_cross_mha(key, d_model):
    ks = jax.random.split(key, 4)
    wq, bq = _init_linear(ks[0], d_model, d_model)
    wk, bk = _init_linear(ks[1], d_model, d_model)
    wv, bv = _init_linear(ks[2], d_model, d_model)
    wo, bo = _init_linear(ks[3], d_model, d_model)
    return dict(wq=wq, bq=bq,
                wkv=jnp.concatenate([wk, wv], axis=1),
                bkv=jnp.concatenate([bk, bv], axis=0),
                wo=wo, bo=bo)


def init_decoder_params(key, d_model, d_ff, num_layers):
    layers = []
    for lkey in jax.random.split(key, num_layers):
        ks = jax.random.split(lkey, 4)
        w1, b1 = _init_linear(ks[2], d_model, d_ff)
        w2, b2 = _init_linear(ks[3], d_ff, d_model)
        layers.append(dict(
            self_attn=_init_self_mha(ks[0], d_model),
            cross_attn=_init_cross_mha(ks[1], d_model),
            ff_w1=w1, ff_b1=b1, ff_w2=w2, ff_b2=b2,
            ln1_g=jnp.ones((d_model,), jnp.float32), ln1_b=jnp.zeros((d_model,), jnp.float32),
            ln2_g=jnp.ones((d_model,), jnp.float32), ln2_b=jnp.zeros((d_model,), jnp.float32),
            ln3_g=jnp.ones((d_model,), jnp.float32), ln3_b=jnp.zeros((d_model,), jnp.float32),
        ))
    return layers


# ---------------------------------------------------------------------------
# Pure-JAX reference of the PyTorch forward (eval mode) for correctness check.
# ---------------------------------------------------------------------------
def _ref_ln(z, g, b, eps=_LN_EPS):
    mu = z.mean(-1, keepdims=True)
    var = ((z - mu) ** 2).mean(-1, keepdims=True)
    return (z - mu) / jnp.sqrt(var + eps) * g + b


def _ref_attn_core(q, k, v, wo, bo, num_heads, causal):
    B, Sq, D = q.shape
    Sk = k.shape[1]
    Dh = D // num_heads
    qh = q.reshape(B, Sq, num_heads, Dh).transpose(0, 2, 1, 3)
    kh = k.reshape(B, Sk, num_heads, Dh).transpose(0, 2, 1, 3)
    vh = v.reshape(B, Sk, num_heads, Dh).transpose(0, 2, 1, 3)
    s = jnp.einsum("bhqd,bhkd->bhqk", qh, kh) / math.sqrt(Dh)
    if causal:
        mask = jnp.tril(jnp.ones((Sq, Sk)))
        s = jnp.where(mask == 0, -1e9, s)
    w = jax.nn.softmax(s, axis=-1)
    ctx = jnp.einsum("bhqk,bhkd->bhqd", w, vh)
    ctx = ctx.transpose(0, 2, 1, 3).reshape(B, Sq, D)
    return ctx @ wo + bo


def ref_decoder_forward(x, enc, params, *, num_heads, causal_tgt=True):
    D = x.shape[-1]
    for lp in params:
        sa = lp["self_attn"]
        qkv = x @ sa["wqkv"] + sa["bqkv"]
        a = _ref_attn_core(qkv[..., :D], qkv[..., D:2 * D], qkv[..., 2 * D:],
                           sa["wo"], sa["bo"], num_heads, causal_tgt)
        x = _ref_ln(x + a, lp["ln1_g"], lp["ln1_b"])

        ca = lp["cross_attn"]
        q = x @ ca["wq"] + ca["bq"]
        kv = enc @ ca["wkv"] + ca["bkv"]
        a = _ref_attn_core(q, kv[..., :D], kv[..., D:],
                           ca["wo"], ca["bo"], num_heads, False)
        x = _ref_ln(x + a, lp["ln2_g"], lp["ln2_b"])

        h = jnp.maximum(x @ lp["ff_w1"] + lp["ff_b1"], 0.0)
        h = h @ lp["ff_w2"] + lp["ff_b2"]
        x = _ref_ln(x + h, lp["ln3_g"], lp["ln3_b"])
    return x


if __name__ == "__main__":
    d_model, num_heads, d_ff, num_layers = 32, 4, 64, 2
    B, S_tgt, S_src = 2, 8, 8

    root = jax.random.PRNGKey(0)
    kx, kenc, kparams = jax.random.split(root, 3)
    x = jax.random.normal(kx, (B, S_tgt, d_model), dtype=jnp.float32)
    enc_output = jax.random.normal(kenc, (B, S_src, d_model), dtype=jnp.float32)
    params = init_decoder_params(kparams, d_model, d_ff, num_layers)

    # Causal target mask (torch convention: 0 = masked), no source mask.
    out = transformer_decoder_forward(x, enc_output, params,
                                      num_heads=num_heads, causal_tgt=True)
    out = jax.block_until_ready(out)

    ref = ref_decoder_forward(x, enc_output, params,
                              num_heads=num_heads, causal_tgt=True)
    assert out.shape == (B, S_tgt, d_model)
    assert jnp.allclose(out, ref, atol=2e-2, rtol=2e-2), "mismatch vs reference"

    print("KERNEL_OK")
</pallas_src>

<mosaic_0001>
module attributes {stable_mosaic.version = 11 : i64} {
  func.func @_self_attn_kernel(%arg0: i32, %arg1: memref<1x8x96xf32, #tpu.memory_space<vmem>>, %arg2: memref<1x8x32xf32, #tpu.memory_space<vmem>>) attributes {dimension_semantics = [#tpu.dimension_semantics<parallel>], iteration_bounds = array<i64: 2>, scalar_prefetch = 0 : i64, scratch_operands = 0 : i64, tpu.core_type = #tpu.core_type<tc>, window_params = [{transform_indices = @transform_0, window_bounds = array<i64: 1, 8, 96>}, {transform_indices = @transform_1, window_bounds = array<i64: 1, 8, 32>}]} {
    %c0 = arith.constant 0 : index
    %c0_0 = arith.constant 0 : index
    %c0_1 = arith.constant 0 : index
    %0 = vector.load %arg1[%c0, %c0_0, %c0_1] : memref<1x8x96xf32, #tpu.memory_space<vmem>>, vector<1x8x96xf32>
    %1 = vector.shape_cast %0 : vector<1x8x96xf32> to vector<8x96xf32>
    %2 = vector.extract_strided_slice %1 {offsets = [0, 0], sizes = [8, 32], strides = [1, 1]} : vector<8x96xf32> to vector<8x32xf32>
    %3 = vector.extract_strided_slice %1 {offsets = [0, 32], sizes = [8, 32], strides = [1, 1]} : vector<8x96xf32> to vector<8x32xf32>
    %4 = vector.extract_strided_slice %1 {offsets = [0, 64], sizes = [8, 32], strides = [1, 1]} : vector<8x96xf32> to vector<8x32xf32>
    %5 = tpu.iota {dimensions = array<i32: 0>} : vector<8x8xi32>
    %6 = tpu.iota {dimensions = array<i32: 1>} : vector<8x8xi32>
    %7 = arith.cmpi sgt, %6, %5 : vector<8x8xi32>
    %8 = vector.extract_strided_slice %2 {offsets = [0, 0], sizes = [8, 8], strides = [1, 1]} : vector<8x32xf32> to vector<8x8xf32>
    %cst = arith.constant 0.353553385 : f32
    %9 = vector.broadcast %cst : f32 to vector<8x8xf32>
    %10 = arith.mulf %8, %9 : vector<8x8xf32>
    %11 = vector.extract_strided_slice %3 {offsets = [0, 0], sizes = [8, 8], strides = [1, 1]} : vector<8x32xf32> to vector<8x8xf32>
    %cst_2 = arith.constant dense<0.000000e+00> : vector<8x8xf32>
    %12 = tpu.matmul %10, %11, %cst_2 {dimension_numbers = #tpu.dot_dimension_numbers<[1], [1], [0], [0], [0, 0, 1, 0], [], []>} : vector<8x8xf32>, vector<8x8xf32>, vector<8x8xf32> -> vector<8x8xf32>
    %cst_3 = arith.constant -1.000000e+09 : f32
    %13 = vector.broadcast %cst_3 : f32 to vector<8x8xf32>
    %14 = arith.select %7, %13, %12 : vector<8x8xi1>, vector<8x8xf32>
    %cst_4 = arith.constant dense<0xFF800000> : vector<8xf32>
    %15 = vector.multi_reduction <maximumf>, %14, %cst_4 [1] : vector<8x8xf32> to vector<8xf32>
    %16 = vector.shape_cast %15 : vector<8xf32> to vector<8x1xf32>
    %17 = vector.broadcast %16 : vector<8x1xf32> to vector<8x8xf32>
    %18 = arith.subf %14, %17 : vector<8x8xf32>
    %19 = math.exp %18 : vector<8x8xf32>
    %cst_5 = arith.constant dense<0.000000e+00> : vector<8xf32>
    %20 = vector.multi_reduction <add>, %19, %cst_5 [1] : vector<8x8xf32> to vector<8xf32>
    %21 = vector.shape_cast %20 : vector<8xf32> to vector<8x1xf32>
    %22 = vector.extract_strided_slice %4 {offsets = [0, 0], sizes = [8, 8], strides = [1, 1]} : vector<8x32xf32> to vector<8x8xf32>
    %cst_6 = arith.constant dense<0.000000e+00> : vector<8x8xf32>
    %23 = tpu.matmul %19, %22, %cst_6 {dimension_numbers = #tpu.dot_dimension_numbers<[1], [0], [0], [1], [0, 0, 1, 1], [], []>} : vector<8x8xf32>, vector<8x8xf32>, vector<8x8xf32> -> vector<8x8xf32>
    %24 = tpu.reciprocal %21 {approx = true} : vector<8x1xf32> -> vector<8x1xf32>
    %25 = vector.broadcast %24 : vector<8x1xf32> to vector<8x8xf32>
    %26 = arith.mulf %23, %25 : vector<8x8xf32>
    %c0_7 = arith.constant 0 : index
    %c0_8 = arith.constant 0 : index
    %c0_9 = arith.constant 0 : index
    %27 = vector.load %arg2[%c0_7, %c0_8, %c0_9] : memref<1x8x32xf32, #tpu.memory_space<vmem>>, vector<1x8x8xf32>
    %28 = vector.shape_cast %27 : vector<1x8x8xf32> to vector<8x8xf32>
    %29 = vector.shape_cast %26 : vector<8x8xf32> to vector<1x8x8xf32>
    tpu.vector_store %arg2[%c0_7, %c0_8, %c0_9], %29 {strides = array<i32>} : memref<1x8x32xf32, #tpu.memory_space<vmem>>, vector<1x8x8xf32>,
    %30 = vector.extract_strided_slice %2 {offsets = [0, 8], sizes = [8, 8], strides = [1, 1]} : vector<8x32xf32> to vector<8x8xf32>
    %cst_10 = arith.constant 0.353553385 : f32
    %31 = vector.broadcast %cst_10 : f32 to vector<8x8xf32>
    %32 = arith.mulf %30, %31 : vector<8x8xf32>
    %33 = vector.extract_strided_slice %3 {offsets = [0, 8], sizes = [8, 8], strides = [1, 1]} : vector<8x32xf32> to vector<8x8xf32>
    %cst_11 = arith.constant dense<0.000000e+00> : vector<8x8xf32>
    %34 = tpu.matmul %32, %33, %cst_11 {dimension_numbers = #tpu.dot_dimension_numbers<[1], [1], [0], [0], [0, 0, 1, 0], [], []>} : vector<8x8xf32>, vector<8x8xf32>, vector<8x8xf32> -> vector<8x8xf32>
    %cst_12 = arith.constant -1.000000e+09 : f32
    %35 = vector.broadcast %cst_12 : f32 to vector<8x8xf32>
    %36 = arith.select %7, %35, %34 : vector<8x8xi1>, vector<8x8xf32>
    %cst_13 = arith.constant dense<0xFF800000> : vector<8xf32>
    %37 = vector.multi_reduction <maximumf>, %36, %cst_13 [1] : vector<8x8xf32> to vector<8xf32>
    %38 = vector.shape_cast %37 : vector<8xf32> to vector<8x1xf32>
    %39 = vector.broadcast %38 : vector<8x1xf32> to vector<8x8xf32>
    %40 = arith.subf %36, %39 : vector<8x8xf32>
    %41 = math.exp %40 : vector<8x8xf32>
    %cst_14 = arith.constant dense<0.000000e+00> : vector<8xf32>
    %42 = vector.multi_reduction <add>, %41, %cst_14 [1] : vector<8x8xf32> to vector<8xf32>
    %43 = vector.shape_cast %42 : vector<8xf32> to vector<8x1xf32>
    %44 = vector.extract_strided_slice %4 {offsets = [0, 8], sizes = [8, 8], strides = [1, 1]} : vector<8x32xf32> to vector<8x8xf32>
    %cst_15 = arith.constant dense<0.000000e+00> : vector<8x8xf32>
    %45 = tpu.matmul %41, %44, %cst_15 {dimension_numbers = #tpu.dot_dimension_numbers<[1], [0], [0], [1], [0, 0, 1, 1], [], []>} : vector<8x8xf32>, vector<8x8xf32>, vector<8x8xf32> -> vector<8x8xf32>
    %46 = tpu.reciprocal %43 {approx = true} : vector<8x1xf32> -> vector<8x1xf32>
    %47 = vector.broadcast %46 : vector<8x1xf32> to vector<8x8xf32>
    %48 = arith.mulf %45, %47 : vector<8x8xf32>
    %c0_16 = arith.constant 0 : index
    %c0_17 = arith.constant 0 : index
    %c8 = arith.constant 8 : index
    %49 = vector.load %arg2[%c0_16, %c0_17, %c8] : memref<1x8x32xf32, #tpu.memory_space<vmem>>, vector<1x8x8xf32>
    %50 = vector.shape_cast %49 : vector<1x8x8xf32> to vector<8x8xf32>
    %51 = vector.shape_cast %48 : vector<8x8xf32> to vector<1x8x8xf32>
    tpu.vector_store %arg2[%c0_16, %c0_17, %c8], %51 {strides = array<i32>} : memref<1x8x32xf32, #tpu.memory_space<vmem>>, vector<1x8x8xf32>,
    %52 = vector.extract_strided_slice %2 {offsets = [0, 16], sizes = [8, 8], strides = [1, 1]} : vector<8x32xf32> to vector<8x8xf32>
    %cst_18 = arith.constant 0.353553385 : f32
    %53 = vector.broadcast %cst_18 : f32 to vector<8x8xf32>
    %54 = arith.mulf %52, %53 : vector<8x8xf32>
    %55 = vector.extract_strided_slice %3 {offsets = [0, 16], sizes = [8, 8], strides = [1, 1]} : vector<8x32xf32> to vector<8x8xf32>
    %cst_19 = arith.constant dense<0.000000e+00> : vector<8x8xf32>
    %56 = tpu.matmul %54, %55, %cst_19 {dimension_numbers = #tpu.dot_dimension_numbers<[1], [1], [0], [0], [0, 0, 1, 0], [], []>} : vector<8x8xf32>, vector<8x8xf32>, vector<8x8xf32> -> vector<8x8xf32>
    %cst_20 = arith.constant -1.000000e+09 : f32
    %57 = vector.broadcast %cst_20 : f32 to vector<8x8xf32>
    %58 = arith.select %7, %57, %56 : vector<8x8xi1>, vector<8x8xf32>
    %cst_21 = arith.constant dense<0xFF800000> : vector<8xf32>
    %59 = vector.multi_reduction <maximumf>, %58, %cst_21 [1] : vector<8x8xf32> to vector<8xf32>
    %60 = vector.shape_cast %59 : vector<8xf32> to vector<8x1xf32>
    %61 = vector.broadcast %60 : vector<8x1xf32> to vector<8x8xf32>
    %62 = arith.subf %58, %61 : vector<8x8xf32>
    %63 = math.exp %62 : vector<8x8xf32>
    %cst_22 = arith.constant dense<0.000000e+00> : vector<8xf32>
    %64 = vector.multi_reduction <add>, %63, %cst_22 [1] : vector<8x8xf32> to vector<8xf32>
    %65 = vector.shape_cast %64 : vector<8xf32> to vector<8x1xf32>
    %66 = vector.extract_strided_slice %4 {offsets = [0, 16], sizes = [8, 8], strides = [1, 1]} : vector<8x32xf32> to vector<8x8xf32>
    %cst_23 = arith.constant dense<0.000000e+00> : vector<8x8xf32>
    %67 = tpu.matmul %63, %66, %cst_23 {dimension_numbers = #tpu.dot_dimension_numbers<[1], [0], [0], [1], [0, 0, 1, 1], [], []>} : vector<8x8xf32>, vector<8x8xf32>, vector<8x8xf32> -> vector<8x8xf32>
    %68 = tpu.reciprocal %65 {approx = true} : vector<8x1xf32> -> vector<8x1xf32>
    %69 = vector.broadcast %68 : vector<8x1xf32> to vector<8x8xf32>
    %70 = arith.mulf %67, %69 : vector<8x8xf32>
    %c0_24 = arith.constant 0 : index
    %c0_25 = arith.constant 0 : index
    %c16 = arith.constant 16 : index
    %71 = vector.load %arg2[%c0_24, %c0_25, %c16] : memref<1x8x32xf32, #tpu.memory_space<vmem>>, vector<1x8x8xf32>
    %72 = vector.shape_cast %71 : vector<1x8x8xf32> to vector<8x8xf32>
    %73 = vector.shape_cast %70 : vector<8x8xf32> to vector<1x8x8xf32>
    tpu.vector_store %arg2[%c0_24, %c0_25, %c16], %73 {strides = array<i32>} : memref<1x8x32xf32, #tpu.memory_space<vmem>>, vector<1x8x8xf32>,
    %74 = vector.extract_strided_slice %2 {offsets = [0, 24], sizes = [8, 8], strides = [1, 1]} : vector<8x32xf32> to vector<8x8xf32>
    %cst_26 = arith.constant 0.353553385 : f32
    %75 = vector.broadcast %cst_26 : f32 to vector<8x8xf32>
    %76 = arith.mulf %74, %75 : vector<8x8xf32>
    %77 = vector.extract_strided_slice %3 {offsets = [0, 24], sizes = [8, 8], strides = [1, 1]} : vector<8x32xf32> to vector<8x8xf32>
    %cst_27 = arith.constant dense<0.000000e+00> : vector<8x8xf32>
    %78 = tpu.matmul %76, %77, %cst_27 {dimension_numbers = #tpu.dot_dimension_numbers<[1], [1], [0], [0], [0, 0, 1, 0], [], []>} : vector<8x8xf32>, vector<8x8xf32>, vector<8x8xf32> -> vector<8x8xf32>
    %cst_28 = arith.constant -1.000000e+09 : f32
    %79 = vector.broadcast %cst_28 : f32 to vector<8x8xf32>
    %80 = arith.select %7, %79, %78 : vector<8x8xi1>, vector<8x8xf32>
    %cst_29 = arith.constant dense<0xFF800000> : vector<8xf32>
    %81 = vector.multi_reduction <maximumf>, %80, %cst_29 [1] : vector<8x8xf32> to vector<8xf32>
    %82 = vector.shape_cast %81 : vector<8xf32> to vector<8x1xf32>
    %83 = vector.broadcast %82 : vector<8x1xf32> to vector<8x8xf32>
    %84 = arith.subf %80, %83 : vector<8x8xf32>
    %85 = math.exp %84 : vector<8x8xf32>
    %cst_30 = arith.constant dense<0.000000e+00> : vector<8xf32>
    %86 = vector.multi_reduction <add>, %85, %cst_30 [1] : vector<8x8xf32> to vector<8xf32>
    %87 = vector.shape_cast %86 : vector<8xf32> to vector<8x1xf32>
    %88 = vector.extract_strided_slice %4 {offsets = [0, 24], sizes = [8, 8], strides = [1, 1]} : vector<8x32xf32> to vector<8x8xf32>
    %cst_31 = arith.constant dense<0.000000e+00> : vector<8x8xf32>
    %89 = tpu.matmul %85, %88, %cst_31 {dimension_numbers = #tpu.dot_dimension_numbers<[1], [0], [0], [1], [0, 0, 1, 1], [], []>} : vector<8x8xf32>, vector<8x8xf32>, vector<8x8xf32> -> vector<8x8xf32>
    %90 = tpu.reciprocal %87 {approx = true} : vector<8x1xf32> -> vector<8x1xf32>
    %91 = vector.broadcast %90 : vector<8x1xf32> to vector<8x8xf32>
    %92 = arith.mulf %89, %91 : vector<8x8xf32>
    %c0_32 = arith.constant 0 : index
    %c0_33 = arith.constant 0 : index
    %c24 = arith.constant 24 : index
    %93 = vector.load %arg2[%c0_32, %c0_33, %c24] : memref<1x8x32xf32, #tpu.memory_space<vmem>>, vector<1x8x8xf32>
    %94 = vector.shape_cast %93 : vector<1x8x8xf32> to vector<8x8xf32>
    %95 = vector.shape_cast %92 : vector<8x8xf32> to vector<1x8x8xf32>
    tpu.vector_store %arg2[%c0_32, %c0_33, %c24], %95 {strides = array<i32>} : memref<1x8x32xf32, #tpu.memory_space<vmem>>, vector<1x8x8xf32>,
    return
  }
  func.func @transform_0(%arg0: i32) -> (i32, i32, i32) {
    %c0_i32 = arith.constant 0 : i32
    %c0_i32_0 = arith.constant 0 : i32
    %c0_i32_1 = arith.constant 0 : i32
    return %arg0, %c0_i32, %c0_i32_0 : i32, i32, i32
  }
  func.func @transform_1(%arg0: i32) -> (i32, i32, i32) {
    %c0_i32 = arith.constant 0 : i32
    %c0_i32_0 = arith.constant 0 : i32
    %c0_i32_1 = arith.constant 0 : i32
    return %arg0, %c0_i32, %c0_i32_0 : i32, i32, i32
  }
}

module attributes {stable_mosaic.version = 11 : i64} {
  func.func @_linear_kernel(%arg0: i32, %arg1: i32, %arg2: memref<8x32xf32, #tpu.memory_space<vmem>>, %arg3: memref<32x32xf32, #tpu.memory_space<vmem>>, %arg4: memref<1x32xf32, #tpu.memory_space<vmem>>, %arg5: memref<8x32xf32, #tpu.memory_space<vmem>>) attributes {dimension_semantics = [#tpu.dimension_semantics<parallel>, #tpu.dimension_semantics<parallel>], iteration_bounds = array<i64: 2, 1>, scalar_prefetch = 0 : i64, scratch_operands = 0 : i64, tpu.core_type = #tpu.core_type<tc>, window_params = [{transform_indices = @transform_0, window_bounds = array<i64: 8, 32>}, {transform_indices = @transform_1, window_bounds = array<i64: 32, 32>}, {transform_indices = @transform_2, window_bounds = array<i64: 1, 32>}, {transform_indices = @transform_3, window_bounds = array<i64: 8, 32>}]} {
    %c0 = arith.constant 0 : index
    %c0_0 = arith.constant 0 : index
    %0 = vector.load %arg2[%c0, %c0_0] : memref<8x32xf32, #tpu.memory_space<vmem>>, vector<8x32xf32>
    %c0_1 = arith.constant 0 : index
    %c0_2 = arith.constant 0 : index
    %1 = vector.load %arg3[%c0_1, %c0_2] : memref<32x32xf32, #tpu.memory_space<vmem>>, vector<32x32xf32>
    %cst = arith.constant dense<0.000000e+00> : vector<8x32xf32>
    %2 = tpu.matmul %0, %1, %cst {dimension_numbers = #tpu.dot_dimension_numbers<[1], [0], [0], [1], [0, 0, 1, 1], [], []>} : vector<8x32xf32>, vector<32x32xf32>, vector<8x32xf32> -> vector<8x32xf32>
    %c0_3 = arith.constant 0 : index
    %c0_4 = arith.constant 0 : index
    %3 = vector.load %arg4[%c0_3, %c0_4] : memref<1x32xf32, #tpu.memory_space<vmem>>, vector<1x32xf32>
    %4 = vector.broadcast %3 : vector<1x32xf32> to vector<8x32xf32>
    %5 = arith.addf %2, %4 : vector<8x32xf32>
    %c0_5 = arith.constant 0 : index
    %c0_6 = arith.constant 0 : index
    %6 = vector.load %arg5[%c0_5, %c0_6] : memref<8x32xf32, #tpu.memory_space<vmem>>, vector<8x32xf32>
    tpu.vector_store %arg5[%c0_5, %c0_6], %5 {strides = array<i32>} : memref<8x32xf32, #tpu.memory_space<vmem>>, vector<8x32xf32>,
    return
  }
  func.func @transform_0(%arg0: i32, %arg1: i32) -> (i32, i32) {
    %c0_i32 = arith.constant 0 : i32
    %c0_i32_0 = arith.constant 0 : i32
    return %arg0, %c0_i32 : i32, i32
  }
  func.func @transform_1(%arg0: i32, %arg1: i32) -> (i32, i32) {
    %c0_i32 = arith.constant 0 : i32
    %c0_i32_0 = arith.constant 0 : i32
    return %c0_i32, %arg1 : i32, i32
  }
  func.func @transform_2(%arg0: i32, %arg1: i32) -> (i32, i32) {
    %c0_i32 = arith.constant 0 : i32
    %c0_i32_0 = arith.constant 0 : i32
    return %c0_i32, %arg1 : i32, i32
  }
  func.func @transform_3(%arg0: i32, %arg1: i32) -> (i32, i32) {
    %c0_i32 = arith.constant 0 : i32
    return %arg0, %arg1 : i32, i32
  }
}

module attributes {stable_mosaic.version = 11 : i64} {
  func.func @_linear_kernel(%arg0: i32, %arg1: i32, %arg2: memref<8x32xf32, #tpu.memory_space<vmem>>, %arg3: memref<32x96xf32, #tpu.memory_space<vmem>>, %arg4: memref<1x96xf32, #tpu.memory_space<vmem>>, %arg5: memref<8x96xf32, #tpu.memory_space<vmem>>) attributes {dimension_semantics = [#tpu.dimension_semantics<parallel>, #tpu.dimension_semantics<parallel>], iteration_bounds = array<i64: 2, 1>, scalar_prefetch = 0 : i64, scratch_operands = 0 : i64, tpu.core_type = #tpu.core_type<tc>, window_params = [{transform_indices = @transform_0, window_bounds = array<i64: 8, 32>}, {transform_indices = @transform_1, window_bounds = array<i64: 32, 96>}, {transform_indices = @transform_2, window_bounds = array<i64: 1, 96>}, {transform_indices = @transform_3, window_bounds = array<i64: 8, 96>}]} {
    %c0 = arith.constant 0 : index
    %c0_0 = arith.constant 0 : index
    %0 = vector.load %arg2[%c0, %c0_0] : memref<8x32xf32, #tpu.memory_space<vmem>>, vector<8x32xf32>
    %c0_1 = arith.constant 0 : index
    %c0_2 = arith.constant 0 : index
    %1 = vector.load %arg3[%c0_1, %c0_2] : memref<32x96xf32, #tpu.memory_space<vmem>>, vector<32x96xf32>
    %cst = arith.constant dense<0.000000e+00> : vector<8x96xf32>
    %2 = tpu.matmul %0, %1, %cst {dimension_numbers = #tpu.dot_dimension_numbers<[1], [0], [0], [1], [0, 0, 1, 1], [], []>} : vector<8x32xf32>, vector<32x96xf32>, vector<8x96xf32> -> vector<8x96xf32>
    %c0_3 = arith.constant 0 : index
    %c0_4 = arith.constant 0 : index
    %3 = vector.load %arg4[%c0_3, %c0_4] : memref<1x96xf32, #tpu.memory_space<vmem>>, vector<1x96xf32>
    %4 = vector.broadcast %3 : vector<1x96xf32> to vector<8x96xf32>
    %5 = arith.addf %2, %4 : vector<8x96xf32>
    %c0_5 = arith.constant 0 : index
    %c0_6 = arith.constant 0 : index
    %6 = vector.load %arg5[%c0_5, %c0_6] : memref<8x96xf32, #tpu.memory_space<vmem>>, vector<8x96xf32>
    tpu.vector_store %arg5[%c0_5, %c0_6], %5 {strides = array<i32>} : memref<8x96xf32, #tpu.memory_space<vmem>>, vector<8x96xf32>,
    return
  }
  func.func @transform_0(%arg0: i32, %arg1: i32) -> (i32, i32) {
    %c0_i32 = arith.constant 0 : i32
    %c0_i32_0 = arith.constant 0 : i32
    return %arg0, %c0_i32 : i32, i32
  }
  func.func @transform_1(%arg0: i32, %arg1: i32) -> (i32, i32) {
    %c0_i32 = arith.constant 0 : i32
    %c0_i32_0 = arith.constant 0 : i32
    return %c0_i32, %arg1 : i32, i32
  }
  func.func @transform_2(%arg0: i32, %arg1: i32) -> (i32, i32) {
    %c0_i32 = arith.constant 0 : i32
    %c0_i32_0 = arith.constant 0 : i32
    return %c0_i32, %arg1 : i32, i32
  }
  func.func @transform_3(%arg0: i32, %arg1: i32) -> (i32, i32) {
    %c0_i32 = arith.constant 0 : i32
    return %arg0, %arg1 : i32, i32
  }
}

module attributes {stable_mosaic.version = 11 : i64} {
  func.func @_proj_add_ln_kernel(%arg0: i32, %arg1: memref<8x32xf32, #tpu.memory_space<vmem>>, %arg2: memref<8x32xf32, #tpu.memory_space<vmem>>, %arg3: memref<32x32xf32, #tpu.memory_space<vmem>>, %arg4: memref<1x32xf32, #tpu.memory_space<vmem>>, %arg5: memref<1x32xf32, #tpu.memory_space<vmem>>, %arg6: memref<1x32xf32, #tpu.memory_space<vmem>>, %arg7: memref<8x32xf32, #tpu.memory_space<vmem>>) attributes {dimension_semantics = [#tpu.dimension_semantics<parallel>], iteration_bounds = array<i64: 2>, scalar_prefetch = 0 : i64, scratch_operands = 0 : i64, tpu.core_type = #tpu.core_type<tc>, window_params = [{transform_indices = @transform_0, window_bounds = array<i64: 8, 32>}, {transform_indices = @transform_1, window_bounds = array<i64: 8, 32>}, {pipeline_mode = #tpu.pipeline_mode<synchronous>, transform_indices = @transform_2, window_bounds = array<i64: 32, 32>}, {pipeline_mode = #tpu.pipeline_mode<synchronous>, transform_indices = @transform_3, window_bounds = array<i64: 1, 32>}, {pipeline_mode = #tpu.pipeline_mode<synchronous>, transform_indices = @transform_4, window_bounds = array<i64: 1, 32>}, {pipeline_mode = #tpu.pipeline_mode<synchronous>, transform_indices = @transform_5, window_bounds = array<i64: 1, 32>}, {transform_indices = @transform_6, window_bounds = array<i64: 8, 32>}]} {
    %c0 = arith.constant 0 : index
    %c0_0 = arith.constant 0 : index
    %0 = vector.load %arg1[%c0, %c0_0] : memref<8x32xf32, #tpu.memory_space<vmem>>, vector<8x32xf32>
    %c0_1 = arith.constant 0 : index
    %c0_2 = arith.constant 0 : index
    %1 = vector.load %arg3[%c0_1, %c0_2] : memref<32x32xf32, #tpu.memory_space<vmem>>, vector<32x32xf32>
    %cst = arith.constant dense<0.000000e+00> : vector<8x32xf32>
    %2 = tpu.matmul %0, %1, %cst {dimension_numbers = #tpu.dot_dimension_numbers<[1], [0], [0], [1], [0, 0, 1, 1], [], []>} : vector<8x32xf32>, vector<32x32xf32>, vector<8x32xf32> -> vector<8x32xf32>
    %c0_3 = arith.constant 0 : index
    %c0_4 = arith.constant 0 : index
    %3 = vector.load %arg4[%c0_3, %c0_4] : memref<1x32xf32, #tpu.memory_space<vmem>>, vector<1x32xf32>
    %4 = vector.broadcast %3 : vector<1x32xf32> to vector<8x32xf32>
    %5 = arith.addf %2, %4 : vector<8x32xf32>
    %c0_5 = arith.constant 0 : index
    %c0_6 = arith.constant 0 : index
    %6 = vector.load %arg2[%c0_5, %c0_6] : memref<8x32xf32, #tpu.memory_space<vmem>>, vector<8x32xf32>
    %7 = arith.addf %5, %6 : vector<8x32xf32>
    %cst_7 = arith.constant dense<0.000000e+00> : vector<8xf32>
    %8 = vector.multi_reduction <add>, %7, %cst_7 [1] : vector<8x32xf32> to vector<8xf32>
    %9 = vector.shape_cast %8 : vector<8xf32> to vector<8x1xf32>
    %cst_8 = arith.constant 3.200000e+01 : f32
    %10 = vector.broadcast %cst_8 : f32 to vector<8x1xf32>
    %11 = arith.divf %9, %10 : vector<8x1xf32>
    %12 = vector.broadcast %11 : vector<8x1xf32> to vector<8x32xf32>
    %13 = arith.subf %7, %12 : vector<8x32xf32>
    %14 = arith.mulf %13, %13 : vector<8x32xf32>
    %cst_9 = arith.constant dense<0.000000e+00> : vector<8xf32>
    %15 = vector.multi_reduction <add>, %14, %cst_9 [1] : vector<8x32xf32> to vector<8xf32>
    %16 = vector.shape_cast %15 : vector<8xf32> to vector<8x1xf32>
    %cst_10 = arith.constant 3.200000e+01 : f32
    %17 = vector.broadcast %cst_10 : f32 to vector<8x1xf32>
    %18 = arith.divf %16, %17 : vector<8x1xf32>
    %cst_11 = arith.constant 9.99999974E-6 : f32
    %19 = vector.broadcast %cst_11 : f32 to vector<8x1xf32>
    %20 = arith.addf %18, %19 : vector<8x1xf32>
    %21 = math.rsqrt %20 : vector<8x1xf32>
    %22 = vector.broadcast %21 : vector<8x1xf32> to vector<8x32xf32>
    %23 = arith.mulf %13, %22 : vector<8x32xf32>
    %c0_12 = arith.constant 0 : index
    %c0_13 = arith.constant 0 : index
    %24 = vector.load %arg5[%c0_12, %c0_13] : memref<1x32xf32, #tpu.memory_space<vmem>>, vector<1x32xf32>
    %25 = vector.broadcast %24 : vector<1x32xf32> to vector<8x32xf32>
    %26 = arith.mulf %23, %25 : vector<8x32xf32>
    %c0_14 = arith.constant 0 : index
    %c0_15 = arith.constant 0 : index
    %27 = vector.load %arg6[%c0_14, %c0_15] : memref<1x32xf32, #tpu.memory_space<vmem>>, vector<1x32xf32>
    %28 = vector.broadcast %27 : vector<1x32xf32> to vector<8x32xf32>
    %29 = arith.addf %26, %28 : vector<8x32xf32>
    %c0_16 = arith.constant 0 : index
    %c0_17 = arith.constant 0 : index
    %30 = vector.load %arg7[%c0_16, %c0_17] : memref<8x32xf32, #tpu.memory_space<vmem>>, vector<8x32xf32>
    tpu.vector_store %arg7[%c0_16, %c0_17], %29 {strides = array<i32>} : memref<8x32xf32, #tpu.memory_space<vmem>>, vector<8x32xf32>,
    return
  }
  func.func @transform_0(%arg0: i32) -> (i32, i32) {
    %c0_i32 = arith.constant 0 : i32
    %c0_i32_0 = arith.constant 0 : i32
    return %arg0, %c0_i32 : i32, i32
  }
  func.func @transform_1(%arg0: i32) -> (i32, i32) {
    %c0_i32 = arith.constant 0 : i32
    %c0_i32_0 = arith.constant 0 : i32
    return %arg0, %c0_i32 : i32, i32
  }
  func.func @transform_2(%arg0: i32) -> (i32, i32) {
    %c0_i32 = arith.constant 0 : i32
    %c0_i32_0 = arith.constant 0 : i32
    %c0_i32_1 = arith.constant 0 : i32
    return %c0_i32, %c0_i32_0 : i32, i32
  }
  func.func @transform_3(%arg0: i32) -> (i32, i32) {
    %c0_i32 = arith.constant 0 : i32
    %c0_i32_0 = arith.constant 0 : i32
    %c0_i32_1 = arith.constant 0 : i32
    return %c0_i32, %c0_i32_0 : i32, i32
  }
  func.func @transform_4(%arg0: i32) -> (i32, i32) {
    %c0_i32 = arith.constant 0 : i32
    %c0_i32_0 = arith.constant 0 : i32
    %c0_i32_1 = arith.constant 0 : i32
    return %c0_i32, %c0_i32_0 : i32, i32
  }
  func.func @transform_5(%arg0: i32) -> (i32, i32) {
    %c0_i32 = arith.constant 0 : i32
    %c0_i32_0 = arith.constant 0 : i32
    %c0_i32_1 = arith.constant 0 : i32
    return %c0_i32, %c0_i32_0 : i32, i32
  }
  func.func @transform_6(%arg0: i32) -> (i32, i32) {
    %c0_i32 = arith.constant 0 : i32
    %c0_i32_0 = arith.constant 0 : i32
    return %arg0, %c0_i32 : i32, i32
  }
}

module attributes {stable_mosaic.version = 11 : i64} {
  func.func @_linear_kernel(%arg0: i32, %arg1: i32, %arg2: memref<8x32xf32, #tpu.memory_space<vmem>>, %arg3: memref<32x64xf32, #tpu.memory_space<vmem>>, %arg4: memref<1x64xf32, #tpu.memory_space<vmem>>, %arg5: memref<8x64xf32, #tpu.memory_space<vmem>>) attributes {dimension_semantics = [#tpu.dimension_semantics<parallel>, #tpu.dimension_semantics<parallel>], iteration_bounds = array<i64: 2, 1>, scalar_prefetch = 0 : i64, scratch_operands = 0 : i64, tpu.core_type = #tpu.core_type<tc>, window_params = [{transform_indices = @transform_0, window_bounds = array<i64: 8, 32>}, {transform_indices = @transform_1, window_bounds = array<i64: 32, 64>}, {transform_indices = @transform_2, window_bounds = array<i64: 1, 64>}, {transform_indices = @transform_3, window_bounds = array<i64: 8, 64>}]} {
    %c0 = arith.constant 0 : index
    %c0_0 = arith.constant 0 : index
    %0 = vector.load %arg2[%c0, %c0_0] : memref<8x32xf32, #tpu.memory_space<vmem>>, vector<8x32xf32>
    %c0_1 = arith.constant 0 : index
    %c0_2 = arith.constant 0 : index
    %1 = vector.load %arg3[%c0_1, %c0_2] : memref<32x64xf32, #tpu.memory_space<vmem>>, vector<32x64xf32>
    %cst = arith.constant dense<0.000000e+00> : vector<8x64xf32>
    %2 = tpu.matmul %0, %1, %cst {dimension_numbers = #tpu.dot_dimension_numbers<[1], [0], [0], [1], [0, 0, 1, 1], [], []>} : vector<8x32xf32>, vector<32x64xf32>, vector<8x64xf32> -> vector<8x64xf32>
    %c0_3 = arith.constant 0 : index
    %c0_4 = arith.constant 0 : index
    %3 = vector.load %arg4[%c0_3, %c0_4] : memref<1x64xf32, #tpu.memory_space<vmem>>, vector<1x64xf32>
    %4 = vector.broadcast %3 : vector<1x64xf32> to vector<8x64xf32>
    %5 = arith.addf %2, %4 : vector<8x64xf32>
    %c0_5 = arith.constant 0 : index
    %c0_6 = arith.constant 0 : index
    %6 = vector.load %arg5[%c0_5, %c0_6] : memref<8x64xf32, #tpu.memory_space<vmem>>, vector<8x64xf32>
    tpu.vector_store %arg5[%c0_5, %c0_6], %5 {strides = array<i32>} : memref<8x64xf32, #tpu.memory_space<vmem>>, vector<8x64xf32>,
    return
  }
  func.func @transform_0(%arg0: i32, %arg1: i32) -> (i32, i32) {
    %c0_i32 = arith.constant 0 : i32
    %c0_i32_0 = arith.constant 0 : i32
    return %arg0, %c0_i32 : i32, i32
  }
  func.func @transform_1(%arg0: i32, %arg1: i32) -> (i32, i32) {
    %c0_i32 = arith.constant 0 : i32
    %c0_i32_0 = arith.constant 0 : i32
    return %c0_i32, %arg1 : i32, i32
  }
  func.func @transform_2(%arg0: i32, %arg1: i32) -> (i32, i32) {
    %c0_i32 = arith.constant 0 : i32
    %c0_i32_0 = arith.constant 0 : i32
    return %c0_i32, %arg1 : i32, i32
  }
  func.func @transform_3(%arg0: i32, %arg1: i32) -> (i32, i32) {
    %c0_i32 = arith.constant 0 : i32
    return %arg0, %arg1 : i32, i32
  }
}

module attributes {stable_mosaic.version = 11 : i64} {
  func.func @_cross_attn_kernel(%arg0: i32, %arg1: memref<1x8x32xf32, #tpu.memory_space<vmem>>, %arg2: memref<1x8x64xf32, #tpu.memory_space<vmem>>, %arg3: memref<1x8x32xf32, #tpu.memory_space<vmem>>) attributes {dimension_semantics = [#tpu.dimension_semantics<parallel>], iteration_bounds = array<i64: 2>, scalar_prefetch = 0 : i64, scratch_operands = 0 : i64, tpu.core_type = #tpu.core_type<tc>, window_params = [{transform_indices = @transform_0, window_bounds = array<i64: 1, 8, 32>}, {transform_indices = @transform_1, window_bounds = array<i64: 1, 8, 64>}, {transform_indices = @transform_2, window_bounds = array<i64: 1, 8, 32>}]} {
    %c0 = arith.constant 0 : index
    %c0_0 = arith.constant 0 : index
    %c0_1 = arith.constant 0 : index
    %0 = vector.load %arg1[%c0, %c0_0, %c0_1] : memref<1x8x32xf32, #tpu.memory_space<vmem>>, vector<1x8x32xf32>
    %1 = vector.shape_cast %0 : vector<1x8x32xf32> to vector<8x32xf32>
    %c0_2 = arith.constant 0 : index
    %c0_3 = arith.constant 0 : index
    %c0_4 = arith.constant 0 : index
    %2 = vector.load %arg2[%c0_2, %c0_3, %c0_4] : memref<1x8x64xf32, #tpu.memory_space<vmem>>, vector<1x8x64xf32>
    %3 = vector.shape_cast %2 : vector<1x8x64xf32> to vector<8x64xf32>
    %4 = vector.extract_strided_slice %3 {offsets = [0, 0], sizes = [8, 32], strides = [1, 1]} : vector<8x64xf32> to vector<8x32xf32>
    %5 = vector.extract_strided_slice %3 {offsets = [0, 32], sizes = [8, 32], strides = [1, 1]} : vector<8x64xf32> to vector<8x32xf32>
    %6 = vector.extract_strided_slice %1 {offsets = [0, 0], sizes = [8, 8], strides = [1, 1]} : vector<8x32xf32> to vector<8x8xf32>
    %cst = arith.constant 0.353553385 : f32
    %7 = vector.broadcast %cst : f32 to vector<8x8xf32>
    %8 = arith.mulf %6, %7 : vector<8x8xf32>
    %9 = vector.extract_strided_slice %4 {offsets = [0, 0], sizes = [8, 8], strides = [1, 1]} : vector<8x32xf32> to vector<8x8xf32>
    %cst_5 = arith.constant dense<0.000000e+00> : vector<8x8xf32>
    %10 = tpu.matmul %8, %9, %cst_5 {dimension_numbers = #tpu.dot_dimension_numbers<[1], [1], [0], [0], [0, 0, 1, 0], [], []>} : vector<8x8xf32>, vector<8x8xf32>, vector<8x8xf32> -> vector<8x8xf32>
    %cst_6 = arith.constant dense<0xFF800000> : vector<8xf32>
    %11 = vector.multi_reduction <maximumf>, %10, %cst_6 [1] : vector<8x8xf32> to vector<8xf32>
    %12 = vector.shape_cast %11 : vector<8xf32> to vector<8x1xf32>
    %13 = vector.broadcast %12 : vector<8x1xf32> to vector<8x8xf32>
    %14 = arith.subf %10, %13 : vector<8x8xf32>
    %15 = math.exp %14 : vector<8x8xf32>
    %cst_7 = arith.constant dense<0.000000e+00> : vector<8xf32>
    %16 = vector.multi_reduction <add>, %15, %cst_7 [1] : vector<8x8xf32> to vector<8xf32>
    %17 = vector.shape_cast %16 : vector<8xf32> to vector<8x1xf32>
    %18 = vector.extract_strided_slice %5 {offsets = [0, 0], sizes = [8, 8], strides = [1, 1]} : vector<8x32xf32> to vector<8x8xf32>
    %cst_8 = arith.constant dense<0.000000e+00> : vector<8x8xf32>
    %19 = tpu.matmul %15, %18, %cst_8 {dimension_numbers = #tpu.dot_dimension_numbers<[1], [0], [0], [1], [0, 0, 1, 1], [], []>} : vector<8x8xf32>, vector<8x8xf32>, vector<8x8xf32> -> vector<8x8xf32>
    %20 = tpu.reciprocal %17 {approx = true} : vector<8x1xf32> -> vector<8x1xf32>
    %21 = vector.broadcast %20 : vector<8x1xf32> to vector<8x8xf32>
    %22 = arith.mulf %19, %21 : vector<8x8xf32>
    %c0_9 = arith.constant 0 : index
    %c0_10 = arith.constant 0 : index
    %c0_11 = arith.constant 0 : index
    %23 = vector.load %arg3[%c0_9, %c0_10, %c0_11] : memref<1x8x32xf32, #tpu.memory_space<vmem>>, vector<1x8x8xf32>
    %24 = vector.shape_cast %23 : vector<1x8x8xf32> to vector<8x8xf32>
    %25 = vector.shape_cast %22 : vector<8x8xf32> to vector<1x8x8xf32>
    tpu.vector_store %arg3[%c0_9, %c0_10, %c0_11], %25 {strides = array<i32>} : memref<1x8x32xf32, #tpu.memory_space<vmem>>, vector<1x8x8xf32>,
    %26 = vector.extract_strided_slice %1 {offsets = [0, 8], sizes = [8, 8], strides = [1, 1]} : vector<8x32xf32> to vector<8x8xf32>
    %cst_12 = arith.constant 0.353553385 : f32
    %27 = vector.broadcast %cst_12 : f32 to vector<8x8xf32>
    %28 = arith.mulf %26, %27 : vector<8x8xf32>
    %29 = vector.extract_strided_slice %4 {offsets = [0, 8], sizes = [8, 8], strides = [1, 1]} : vector<8x32xf32> to vector<8x8xf32>
    %cst_13 = arith.constant dense<0.000000e+00> : vector<8x8xf32>
    %30 = tpu.matmul %28, %29, %cst_13 {dimension_numbers = #tpu.dot_dimension_numbers<[1], [1], [0], [0], [0, 0, 1, 0], [], []>} : vector<8x8xf32>, vector<8x8xf32>, vector<8x8xf32> -> vector<8x8xf32>
    %cst_14 = arith.constant dense<0xFF800000> : vector<8xf32>
    %31 = vector.multi_reduction <maximumf>, %30, %cst_14 [1] : vector<8x8xf32> to vector<8xf32>
    %32 = vector.shape_cast %31 : vector<8xf32> to vector<8x1xf32>
    %33 = vector.broadcast %32 : vector<8x1xf32> to vector<8x8xf32>
    %34 = arith.subf %30, %33 : vector<8x8xf32>
    %35 = math.exp %34 : vector<8x8xf32>
    %cst_15 = arith.constant dense<0.000000e+00> : vector<8xf32>
    %36 = vector.multi_reduction <add>, %35, %cst_15 [1] : vector<8x8xf32> to vector<8xf32>
    %37 = vector.shape_cast %36 : vector<8xf32> to vector<8x1xf32>
    %38 = vector.extract_strided_slice %5 {offsets = [0, 8], sizes = [8, 8], strides = [1, 1]} : vector<8x32xf32> to vector<8x8xf32>
    %cst_16 = arith.constant dense<0.000000e+00> : vector<8x8xf32>
    %39 = tpu.matmul %35, %38, %cst_16 {dimension_numbers = #tpu.dot_dimension_numbers<[1], [0], [0], [1], [0, 0, 1, 1], [], []>} : vector<8x8xf32>, vector<8x8xf32>, vector<8x8xf32> -> vector<8x8xf32>
    %40 = tpu.reciprocal %37 {approx = true} : vector<8x1xf32> -> vector<8x1xf32>
    %41 = vector.broadcast %40 : vector<8x1xf32> to vector<8x8xf32>
    %42 = arith.mulf %39, %41 : vector<8x8xf32>
    %c0_17 = arith.constant 0 : index
    %c0_18 = arith.constant 0 : index
    %c8 = arith.constant 8 : index
    %43 = vector.load %arg3[%c0_17, %c0_18, %c8] : memref<1x8x32xf32, #tpu.memory_space<vmem>>, vector<1x8x8xf32>
    %44 = vector.shape_cast %43 : vector<1x8x8xf32> to vector<8x8xf32>
    %45 = vector.shape_cast %42 : vector<8x8xf32> to vector<1x8x8xf32>
    tpu.vector_store %arg3[%c0_17, %c0_18, %c8], %45 {strides = array<i32>} : memref<1x8x32xf32, #tpu.memory_space<vmem>>, vector<1x8x8xf32>,
    %46 = vector.extract_strided_slice %1 {offsets = [0, 16], sizes = [8, 8], strides = [1, 1]} : vector<8x32xf32> to vector<8x8xf32>
    %cst_19 = arith.constant 0.353553385 : f32
    %47 = vector.broadcast %cst_19 : f32 to vector<8x8xf32>
    %48 = arith.mulf %46, %47 : vector<8x8xf32>
    %49 = vector.extract_strided_slice %4 {offsets = [0, 16], sizes = [8, 8], strides = [1, 1]} : vector<8x32xf32> to vector<8x8xf32>
    %cst_20 = arith.constant dense<0.000000e+00> : vector<8x8xf32>
    %50 = tpu.matmul %48, %49, %cst_20 {dimension_numbers = #tpu.dot_dimension_numbers<[1], [1], [0], [0], [0, 0, 1, 0], [], []>} : vector<8x8xf32>, vector<8x8xf32>, vector<8x8xf32> -> vector<8x8xf32>
    %cst_21 = arith.constant dense<0xFF800000> : vector<8xf32>
    %51 = vector.multi_reduction <maximumf>, %50, %cst_21 [1] : vector<8x8xf32> to vector<8xf32>
    %52 = vector.shape_cast %51 : vector<8xf32> to vector<8x1xf32>
    %53 = vector.broadcast %52 : vector<8x1xf32> to vector<8x8xf32>
    %54 = arith.subf %50, %53 : vector<8x8xf32>
    %55 = math.exp %54 : vector<8x8xf32>
    %cst_22 = arith.constant dense<0.000000e+00> : vector<8xf32>
    %56 = vector.multi_reduction <add>, %55, %cst_22 [1] : vector<8x8xf32> to vector<8xf32>
    %57 = vector.shape_cast %56 : vector<8xf32> to vector<8x1xf32>
    %58 = vector.extract_strided_slice %5 {offsets = [0, 16], sizes = [8, 8], strides = [1, 1]} : vector<8x32xf32> to vector<8x8xf32>
    %cst_23 = arith.constant dense<0.000000e+00> : vector<8x8xf32>
    %59 = tpu.matmul %55, %58, %cst_23 {dimension_numbers = #tpu.dot_dimension_numbers<[1], [0], [0], [1], [0, 0, 1, 1], [], []>} : vector<8x8xf32>, vector<8x8xf32>, vector<8x8xf32> -> vector<8x8xf32>
    %60 = tpu.reciprocal %57 {approx = true} : vector<8x1xf32> -> vector<8x1xf32>
    %61 = vector.broadcast %60 : vector<8x1xf32> to vector<8x8xf32>
    %62 = arith.mulf %59, %61 : vector<8x8xf32>
    %c0_24 = arith.constant 0 : index
    %c0_25 = arith.constant 0 : index
    %c16 = arith.constant 16 : index
    %63 = vector.load %arg3[%c0_24, %c0_25, %c16] : memref<1x8x32xf32, #tpu.memory_space<vmem>>, vector<1x8x8xf32>
    %64 = vector.shape_cast %63 : vector<1x8x8xf32> to vector<8x8xf32>
    %65 = vector.shape_cast %62 : vector<8x8xf32> to vector<1x8x8xf32>
    tpu.vector_store %arg3[%c0_24, %c0_25, %c16], %65 {strides = array<i32>} : memref<1x8x32xf32, #tpu.memory_space<vmem>>, vector<1x8x8xf32>,
    %66 = vector.extract_strided_slice %1 {offsets = [0, 24], sizes = [8, 8], strides = [1, 1]} : vector<8x32xf32> to vector<8x8xf32>
    %cst_26 = arith.constant 0.353553385 : f32
    %67 = vector.broadcast %cst_26 : f32 to vector<8x8xf32>
    %68 = arith.mulf %66, %67 : vector<8x8xf32>
    %69 = vector.extract_strided_slice %4 {offsets = [0, 24], sizes = [8, 8], strides = [1, 1]} : vector<8x32xf32> to vector<8x8xf32>
    %cst_27 = arith.constant dense<0.000000e+00> : vector<8x8xf32>
    %70 = tpu.matmul %68, %69, %cst_27 {dimension_numbers = #tpu.dot_dimension_numbers<[1], [1], [0], [0], [0, 0, 1, 0], [], []>} : vector<8x8xf32>, vector<8x8xf32>, vector<8x8xf32> -> vector<8x8xf32>
    %cst_28 = arith.constant dense<0xFF800000> : vector<8xf32>
    %71 = vector.multi_reduction <maximumf>, %70, %cst_28 [1] : vector<8x8xf32> to vector<8xf32>
    %72 = vector.shape_cast %71 : vector<8xf32> to vector<8x1xf32>
    %73 = vector.broadcast %72 : vector<8x1xf32> to vector<8x8xf32>
    %74 = arith.subf %70, %73 : vector<8x8xf32>
    %75 = math.exp %74 : vector<8x8xf32>
    %cst_29 = arith.constant dense<0.000000e+00> : vector<8xf32>
    %76 = vector.multi_reduction <add>, %75, %cst_29 [1] : vector<8x8xf32> to vector<8xf32>
    %77 = vector.shape_cast %76 : vector<8xf32> to vector<8x1xf32>
    %78 = vector.extract_strided_slice %5 {offsets = [0, 24], sizes = [8, 8], strides = [1, 1]} : vector<8x32xf32> to vector<8x8xf32>
    %cst_30 = arith.constant dense<0.000000e+00> : vector<8x8xf32>
    %79 = tpu.matmul %75, %78, %cst_30 {dimension_numbers = #tpu.dot_dimension_numbers<[1], [0], [0], [1], [0, 0, 1, 1], [], []>} : vector<8x8xf32>, vector<8x8xf32>, vector<8x8xf32> -> vector<8x8xf32>
    %80 = tpu.reciprocal %77 {approx = true} : vector<8x1xf32> -> vector<8x1xf32>
    %81 = vector.broadcast %80 : vector<8x1xf32> to vector<8x8xf32>
    %82 = arith.mulf %79, %81 : vector<8x8xf32>
    %c0_31 = arith.constant 0 : index
    %c0_32 = arith.constant 0 : index
    %c24 = arith.constant 24 : index
    %83 = vector.load %arg3[%c0_31, %c0_32, %c24] : memref<1x8x32xf32, #tpu.memory_space<vmem>>, vector<1x8x8xf32>
    %84 = vector.shape_cast %83 : vector<1x8x8xf32> to vector<8x8xf32>
    %85 = vector.shape_cast %82 : vector<8x8xf32> to vector<1x8x8xf32>
    tpu.vector_store %arg3[%c0_31, %c0_32, %c24], %85 {strides = array<i32>} : memref<1x8x32xf32, #tpu.memory_space<vmem>>, vector<1x8x8xf32>,
    return
  }
  func.func @transform_0(%arg0: i32) -> (i32, i32, i32) {
    %c0_i32 = arith.constant 0 : i32
    %c0_i32_0 = arith.constant 0 : i32
    %c0_i32_1 = arith.constant 0 : i32
    return %arg0, %c0_i32, %c0_i32_0 : i32, i32, i32
  }
  func.func @transform_1(%arg0: i32) -> (i32, i32, i32) {
    %c0_i32 = arith.constant 0 : i32
    %c0_i32_0 = arith.constant 0 : i32
    %c0_i32_1 = arith.constant 0 : i32
    return %arg0, %c0_i32, %c0_i32_0 : i32, i32, i32
  }
  func.func @transform_2(%arg0: i32) -> (i32, i32, i32) {
    %c0_i32 = arith.constant 0 : i32
    %c0_i32_0 = arith.constant 0 : i32
    %c0_i32_1 = arith.constant 0 : i32
    return %arg0, %c0_i32, %c0_i32_0 : i32, i32, i32
  }
}

module attributes {stable_mosaic.version = 11 : i64} {
  func.func @_ffn_add_ln_kernel(%arg0: i32, %arg1: i32, %arg2: memref<8x32xf32, #tpu.memory_space<vmem>>, %arg3: memref<32x64xf32, #tpu.memory_space<vmem>>, %arg4: memref<1x64xf32, #tpu.memory_space<vmem>>, %arg5: memref<64x32xf32, #tpu.memory_space<vmem>>, %arg6: memref<1x32xf32, #tpu.memory_space<vmem>>, %arg7: memref<1x32xf32, #tpu.memory_space<vmem>>, %arg8: memref<1x32xf32, #tpu.memory_space<vmem>>, %arg9: memref<8x32xf32, #tpu.memory_space<vmem>>, %arg10: memref<8x32xf32, #tpu.memory_space<vmem>>) attributes {dimension_semantics = [#tpu.dimension_semantics<parallel>, #tpu.dimension_semantics<arbitrary>], iteration_bounds = array<i64: 2, 1>, scalar_prefetch = 0 : i64, scratch_operands = 1 : i64, tpu.core_type = #tpu.core_type<tc>, window_params = [{transform_indices = @transform_0, window_bounds = array<i64: 8, 32>}, {transform_indices = @transform_1, window_bounds = array<i64: 32, 64>}, {transform_indices = @transform_2, window_bounds = array<i64: 1, 64>}, {transform_indices = @transform_3, window_bounds = array<i64: 64, 32>}, {pipeline_mode = #tpu.pipeline_mode<synchronous>, transform_indices = @transform_4, window_bounds = array<i64: 1, 32>}, {pipeline_mode = #tpu.pipeline_mode<synchronous>, transform_indices = @transform_5, window_bounds = array<i64: 1, 32>}, {pipeline_mode = #tpu.pipeline_mode<synchronous>, transform_indices = @transform_6, window_bounds = array<i64: 1, 32>}, {transform_indices = @transform_7, window_bounds = array<i64: 8, 32>}]} {
    %c0_i32 = arith.constant 0 : i32
    %0 = arith.cmpi eq, %arg1, %c0_i32 : i32
    %1 = arith.extui %0 : i1 to i32
    %c0_i32_0 = arith.constant 0 : i32
    %2 = arith.cmpi ne, %1, %c0_i32_0 : i32
    scf.if %2 {
      %cst_16 = arith.constant 0.000000e+00 : f32
      %19 = vector.broadcast %cst_16 : f32 to vector<8x32xf32>
      %c0_17 = arith.constant 0 : index
      %c0_18 = arith.constant 0 : index
      %20 = vector.load %arg10[%c0_17, %c0_18] : memref<8x32xf32, #tpu.memory_space<vmem>>, vector<8x32xf32>
      tpu.vector_store %arg10[%c0_17, %c0_18], %19 {strides = array<i32>} : memref<8x32xf32, #tpu.memory_space<vmem>>, vector<8x32xf32>,
    } else {
    }
    %c0 = arith.constant 0 : index
    %c0_1 = arith.constant 0 : index
    %3 = vector.load %arg2[%c0, %c0_1] : memref<8x32xf32, #tpu.memory_space<vmem>>, vector<8x32xf32>
    %c0_2 = arith.constant 0 : index
    %c0_3 = arith.constant 0 : index
    %4 = vector.load %arg3[%c0_2, %c0_3] : memref<32x64xf32, #tpu.memory_space<vmem>>, vector<32x64xf32>
    %cst = arith.constant dense<0.000000e+00> : vector<8x64xf32>
    %5 = tpu.matmul %3, %4, %cst {dimension_numbers = #tpu.dot_dimension_numbers<[1], [0], [0], [1], [0, 0, 1, 1], [], []>} : vector<8x32xf32>, vector<32x64xf32>, vector<8x64xf32> -> vector<8x64xf32>
    %c0_4 = arith.constant 0 : index
    %c0_5 = arith.constant 0 : index
    %6 = vector.load %arg4[%c0_4, %c0_5] : memref<1x64xf32, #tpu.memory_space<vmem>>, vector<1x64xf32>
    %7 = vector.broadcast %6 : vector<1x64xf32> to vector<8x64xf32>
    %8 = arith.addf %5, %7 : vector<8x64xf32>
    %cst_6 = arith.constant 0.000000e+00 : f32
    %9 = vector.broadcast %cst_6 : f32 to vector<8x64xf32>
    %10 = arith.maximumf %8, %9 : vector<8x64xf32>
    %c0_7 = arith.constant 0 : index
    %c0_8 = arith.constant 0 : index
    %11 = vector.load %arg10[%c0_7, %c0_8] : memref<8x32xf32, #tpu.memory_space<vmem>>, vector<8x32xf32>
    %c0_9 = arith.constant 0 : index
    %c0_10 = arith.constant 0 : index
    %12 = vector.load %arg5[%c0_9, %c0_10] : memref<64x32xf32, #tpu.memory_space<vmem>>, vector<64x32xf32>
    %cst_11 = arith.constant dense<0.000000e+00> : vector<8x32xf32>
    %13 = tpu.matmul %10, %12, %cst_11 {dimension_numbers = #tpu.dot_dimension_numbers<[1], [0], [0], [1], [0, 0, 1, 1], [], []>} : vector<8x64xf32>, vector<64x32xf32>, vector<8x32xf32> -> vector<8x32xf32>
    %14 = arith.addf %11, %13 : vector<8x32xf32>
    %c0_12 = arith.constant 0 : index
    %c0_13 = arith.constant 0 : index
    %15 = vector.load %arg10[%c0_12, %c0_13] : memref<8x32xf32, #tpu.memory_space<vmem>>, vector<8x32xf32>
    tpu.vector_store %arg10[%c0_12, %c0_13], %14 {strides = array<i32>} : memref<8x32xf32, #tpu.memory_space<vmem>>, vector<8x32xf32>,
    %c0_i32_14 = arith.constant 0 : i32
    %16 = arith.cmpi eq, %arg1, %c0_i32_14 : i32
    %17 = arith.extui %16 : i1 to i32
    %c0_i32_15 = arith.constant 0 : i32
    %18 = arith.cmpi ne, %17, %c0_i32_15 : i32
    scf.if %18 {
      %c0_16 = arith.constant 0 : index
      %c0_17 = arith.constant 0 : index
      %19 = vector.load %arg10[%c0_16, %c0_17] : memref<8x32xf32, #tpu.memory_space<vmem>>, vector<8x32xf32>
      %c0_18 = arith.constant 0 : index
      %c0_19 = arith.constant 0 : index
      %20 = vector.load %arg6[%c0_18, %c0_19] : memref<1x32xf32, #tpu.memory_space<vmem>>, vector<1x32xf32>
      %21 = vector.broadcast %20 : vector<1x32xf32> to vector<8x32xf32>
      %22 = arith.addf %19, %21 : vector<8x32xf32>
      %23 = arith.addf %22, %3 : vector<8x32xf32>
      %cst_20 = arith.constant dense<0.000000e+00> : vector<8xf32>
      %24 = vector.multi_reduction <add>, %23, %cst_20 [1] : vector<8x32xf32> to vector<8xf32>
      %25 = vector.shape_cast %24 : vector<8xf32> to vector<8x1xf32>
      %cst_21 = arith.constant 3.200000e+01 : f32
      %26 = vector.broadcast %cst_21 : f32 to vector<8x1xf32>
      %27 = arith.divf %25, %26 : vector<8x1xf32>
      %28 = vector.broadcast %27 : vector<8x1xf32> to vector<8x32xf32>
      %29 = arith.subf %23, %28 : vector<8x32xf32>
      %30 = arith.mulf %29, %29 : vector<8x32xf32>
      %cst_22 = arith.constant dense<0.000000e+00> : vector<8xf32>
      %31 = vector.multi_reduction <add>, %30, %cst_22 [1] : vector<8x32xf32> to vector<8xf32>
      %32 = vector.shape_cast %31 : vector<8xf32> to vector<8x1xf32>
      %cst_23 = arith.constant 3.200000e+01 : f32
      %33 = vector.broadcast %cst_23 : f32 to vector<8x1xf32>
      %34 = arith.divf %32, %33 : vector<8x1xf32>
      %cst_24 = arith.constant 9.99999974E-6 : f32
      %35 = vector.broadcast %cst_24 : f32 to vector<8x1xf32>
      %36 = arith.addf %34, %35 : vector<8x1xf32>
      %37 = math.rsqrt %36 : vector<8x1xf32>
      %38 = vector.broadcast %37 : vector<8x1xf32> to vector<8x32xf32>
      %39 = arith.mulf %29, %38 : vector<8x32xf32>
      %c0_25 = arith.constant 0 : index
      %c0_26 = arith.constant 0 : index
      %40 = vector.load %arg7[%c0_25, %c0_26] : memref<1x32xf32, #tpu.memory_space<vmem>>, vector<1x32xf32>
      %41 = vector.broadcast %40 : vector<1x32xf32> to vector<8x32xf32>
      %42 = arith.mulf %39, %41 : vector<8x32xf32>
      %c0_27 = arith.constant 0 : index
      %c0_28 = arith.constant 0 : index
      %43 = vector.load %arg8[%c0_27, %c0_28] : memref<1x32xf32, #tpu.memory_space<vmem>>, vector<1x32xf32>
      %44 = vector.broadcast %43 : vector<1x32xf32> to vector<8x32xf32>
      %45 = arith.addf %42, %44 : vector<8x32xf32>
      %c0_29 = arith.constant 0 : index
      %c0_30 = arith.constant 0 : index
      %46 = vector.load %arg9[%c0_29, %c0_30] : memref<8x32xf32, #tpu.memory_space<vmem>>, vector<8x32xf32>
      tpu.vector_store %arg9[%c0_29, %c0_30], %45 {strides = array<i32>} : memref<8x32xf32, #tpu.memory_space<vmem>>, vector<8x32xf32>,
    } else {
    }
    return
  }
  func.func @transform_0(%arg0: i32, %arg1: i32) -> (i32, i32) {
    %c0_i32 = arith.constant 0 : i32
    %c0_i32_0 = arith.constant 0 : i32
    return %arg0, %c0_i32 : i32, i32
  }
  func.func @transform_1(%arg0: i32, %arg1: i32) -> (i32, i32) {
    %c0_i32 = arith.constant 0 : i32
    %c0_i32_0 = arith.constant 0 : i32
    return %c0_i32, %arg1 : i32, i32
  }
  func.func @transform_2(%arg0: i32, %arg1: i32) -> (i32, i32) {
    %c0_i32 = arith.constant 0 : i32
    %c0_i32_0 = arith.constant 0 : i32
    return %c0_i32, %arg1 : i32, i32
  }
  func.func @transform_3(%arg0: i32, %arg1: i32) -> (i32, i32) {
    %c0_i32 = arith.constant 0 : i32
    %c0_i32_0 = arith.constant 0 : i32
    return %arg1, %c0_i32 : i32, i32
  }
  func.func @transform_4(%arg0: i32, %arg1: i32) -> (i32, i32) {
    %c0_i32 = arith.constant 0 : i32
    %c0_i32_0 = arith.constant 0 : i32
    %c0_i32_1 = arith.constant 0 : i32
    return %c0_i32, %c0_i32_0 : i32, i32
  }
  func.func @transform_5(%arg0: i32, %arg1: i32) -> (i32, i32) {
    %c0_i32 = arith.constant 0 : i32
    %c0_i32_0 = arith.constant 0 : i32
    %c0_i32_1 = arith.constant 0 : i32
    return %c0_i32, %c0_i32_0 : i32, i32
  }
  func.func @transform_6(%arg0: i32, %arg1: i32) -> (i32, i32) {
    %c0_i32 = arith.constant 0 : i32
    %c0_i32_0 = arith.constant 0 : i32
    %c0_i32_1 = arith.constant 0 : i32
    return %c0_i32, %c0_i32_0 : i32, i32
  }
  func.func @transform_7(%arg0: i32, %arg1: i32) -> (i32, i32) {
    %c0_i32 = arith.constant 0 : i32
    %c0_i32_0 = arith.constant 0 : i32
    return %arg0, %c0_i32 : i32, i32
  }
}

module attributes {stable_mosaic.version = 11 : i64} {
  func.func @_ffn_add_ln_kernel(%arg0: i32, %arg1: i32, %arg2: memref<8x32xf32, #tpu.memory_space<vmem>>, %arg3: memref<32x64xf32, #tpu.memory_space<vmem>>, %arg4: memref<1x64xf32, #tpu.memory_space<vmem>>, %arg5: memref<64x32xf32, #tpu.memory_space<vmem>>, %arg6: memref<1x32xf32, #tpu.memory_space<vmem>>, %arg7: memref<1x32xf32, #tpu.memory_space<vmem>>, %arg8: memref<1x32xf32, #tpu.memory_space<vmem>>, %arg9: memref<8x32xf32, #tpu.memory_space<vmem>>, %arg10: memref<8x32xf32, #tpu.memory_space<vmem>>) attributes {dimension_semantics = [#tpu.dimension_semantics<parallel>, #tpu.dimension_semantics<arbitrary>], iteration_bounds = array<i64: 2, 1>, scalar_prefetch = 0 : i64, scratch_operands = 1 : i64, tpu.core_type = #tpu.core_type<tc>, window_params = [{transform_indices = @transform_0, window_bounds = array<i64: 8, 32>}, {transform_indices = @transform_1, window_bounds = array<i64: 32, 64>}, {transform_indices = @transform_2, window_bounds = array<i64: 1, 64>}, {transform_indices = @transform_3, window_bounds = array<i64: 64, 32>}, {pipeline_mode = #tpu.pipeline_mode<synchronous>, transform_indices = @transform_4, window_bounds = array<i64: 1, 32>}, {pipeline_mode = #tpu.pipeline_mode<synchronous>, transform_indices = @transform_5, window_bounds = array<i64: 1, 32>}, {pipeline_mode = #tpu.pipeline_mode<synchronous>, transform_indices = @transform_6, window_bounds = array<i64: 1, 32>}, {transform_indices = @transform_7, window_bounds = array<i64: 8, 32>}]} {
    %c0_i32 = arith.constant 0 : i32
    %0 = arith.cmpi eq, %arg1, %c0_i32 : i32
    %1 = arith.extui %0 : i1 to i32
    %c0_i32_0 = arith.constant 0 : i32
    %2 = arith.cmpi ne, %1, %c0_i32_0 : i32
    scf.if %2 {
      %cst_16 = arith.constant 0.000000e+00 : f32
      %19 = vector.broadcast %cst_16 : f32 to vector<8x32xf32>
      %c0_17 = arith.constant 0 : index
      %c0_18 = arith.constant 0 : index
      %20 = vector.load %arg10[%c0_17, %c0_18] : memref<8x32xf32, #tpu.memory_space<vmem>>, vector<8x32xf32>
      tpu.vector_store %arg10[%c0_17, %c0_18], %19 {strides = array<i32>} : memref<8x32xf32, #tpu.memory_space<vmem>>, vector<8x32xf32>,
    } else {
    }
    %c0 = arith.constant 0 : index
    %c0_1 = arith.constant 0 : index
    %3 = vector.load %arg2[%c0, %c0_1] : memref<8x32xf32, #tpu.memory_space<vmem>>, vector<8x32xf32>
    %c0_2 = arith.constant 0 : index
    %c0_3 = arith.constant 0 : index
    %4 = vector.load %arg3[%c0_2, %c0_3] : memref<32x64xf32, #tpu.memory_space<vmem>>, vector<32x64xf32>
    %cst = arith.constant dense<0.000000e+00> : vector<8x64xf32>
    %5 = tpu.matmul %3, %4, %cst {dimension_numbers = #tpu.dot_dimension_numbers<[1], [0], [0], [1], [0, 0, 1, 1], [], []>} : vector<8x32xf32>, vector<32x64xf32>, vector<8x64xf32> -> vector<8x64xf32>
    %c0_4 = arith.constant 0 : index
    %c0_5 = arith.constant 0 : index
    %6 = vector.load %arg4[%c0_4, %c0_5] : memref<1x64xf32, #tpu.memory_space<vmem>>, vector<1x64xf32>
    %7 = vector.broadcast %6 : vector<1x64xf32> to vector<8x64xf32>
    %8 = arith.addf %5, %7 : vector<8x64xf32>
    %cst_6 = arith.constant 0.000000e+00 : f32
    %9 = vector.broadcast %cst_6 : f32 to vector<8x64xf32>
    %10 = arith.maximumf %8, %9 : vector<8x64xf32>
    %c0_7 = arith.constant 0 : index
    %c0_8 = arith.constant 0 : index
    %11 = vector.load %arg10[%c0_7, %c0_8] : memref<8x32xf32, #tpu.memory_space<vmem>>, vector<8x32xf32>
    %c0_9 = arith.constant 0 : index
    %c0_10 = arith.constant 0 : index
    %12 = vector.load %arg5[%c0_9, %c0_10] : memref<64x32xf32, #tpu.memory_space<vmem>>, vector<64x32xf32>
    %cst_11 = arith.constant dense<0.000000e+00> : vector<8x32xf32>
    %13 = tpu.matmul %10, %12, %cst_11 {dimension_numbers = #tpu.dot_dimension_numbers<[1], [0], [0], [1], [0, 0, 1, 1], [], []>} : vector<8x64xf32>, vector<64x32xf32>, vector<8x32xf32> -> vector<8x32xf32>
    %14 = arith.addf %11, %13 : vector<8x32xf32>
    %c0_12 = arith.constant 0 : index
    %c0_13 = arith.constant 0 : index
    %15 = vector.load %arg10[%c0_12, %c0_13] : memref<8x32xf32, #tpu.memory_space<vmem>>, vector<8x32xf32>
    tpu.vector_store %arg10[%c0_12, %c0_13], %14 {strides = array<i32>} : memref<8x32xf32, #tpu.memory_space<vmem>>, vector<8x32xf32>,
    %c0_i32_14 = arith.constant 0 : i32
    %16 = arith.cmpi eq, %arg1, %c0_i32_14 : i32
    %17 = arith.extui %16 : i1 to i32
    %c0_i32_15 = arith.constant 0 : i32
    %18 = arith.cmpi ne, %17, %c0_i32_15 : i32
    scf.if %18 {
      %c0_16 = arith.constant 0 : index
      %c0_17 = arith.constant 0 : index
      %19 = vector.load %arg10[%c0_16, %c0_17] : memref<8x32xf32, #tpu.memory_space<vmem>>, vector<8x32xf32>
      %c0_18 = arith.constant 0 : index
      %c0_19 = arith.constant 0 : index
      %20 = vector.load %arg6[%c0_18, %c0_19] : memref<1x32xf32, #tpu.memory_space<vmem>>, vector<1x32xf32>
      %21 = vector.broadcast %20 : vector<1x32xf32> to vector<8x32xf32>
      %22 = arith.addf %19, %21 : vector<8x32xf32>
      %23 = arith.addf %22, %3 : vector<8x32xf32>
      %cst_20 = arith.constant dense<0.000000e+00> : vector<8xf32>
      %24 = vector.multi_reduction <add>, %23, %cst_20 [1] : vector<8x32xf32> to vector<8xf32>
      %25 = vector.shape_cast %24 : vector<8xf32> to vector<8x1xf32>
      %cst_21 = arith.constant 3.200000e+01 : f32
      %26 = vector.broadcast %cst_21 : f32 to vector<8x1xf32>
      %27 = arith.divf %25, %26 : vector<8x1xf32>
      %28 = vector.broadcast %27 : vector<8x1xf32> to vector<8x32xf32>
      %29 = arith.subf %23, %28 : vector<8x32xf32>
      %30 = arith.mulf %29, %29 : vector<8x32xf32>
      %cst_22 = arith.constant dense<0.000000e+00> : vector<8xf32>
      %31 = vector.multi_reduction <add>, %30, %cst_22 [1] : vector<8x32xf32> to vector<8xf32>
      %32 = vector.shape_cast %31 : vector<8xf32> to vector<8x1xf32>
      %cst_23 = arith.constant 3.200000e+01 : f32
      %33 = vector.broadcast %cst_23 : f32 to vector<8x1xf32>
      %34 = arith.divf %32, %33 : vector<8x1xf32>
      %cst_24 = arith.constant 9.99999974E-6 : f32
      %35 = vector.broadcast %cst_24 : f32 to vector<8x1xf32>
      %36 = arith.addf %34, %35 : vector<8x1xf32>
      %37 = math.rsqrt %36 : vector<8x1xf32>
      %38 = vector.broadcast %37 : vector<8x1xf32> to vector<8x32xf32>
      %39 = arith.mulf %29, %38 : vector<8x32xf32>
      %c0_25 = arith.constant 0 : index
      %c0_26 = arith.constant 0 : index
      %40 = vector.load %arg7[%c0_25, %c0_26] : memref<1x32xf32, #tpu.memory_space<vmem>>, vector<1x32xf32>
      %41 = vector.broadcast %40 : vector<1x32xf32> to vector<8x32xf32>
      %42 = arith.mulf %39, %41 : vector<8x32xf32>
      %c0_27 = arith.constant 0 : index
      %c0_28 = arith.constant 0 : index
      %43 = vector.load %arg8[%c0_27, %c0_28] : memref<1x32xf32, #tpu.memory_space<vmem>>, vector<1x32xf32>
      %44 = vector.broadcast %43 : vector<1x32xf32> to vector<8x32xf32>
      %45 = arith.addf %42, %44 : vector<8x32xf32>
      %c0_29 = arith.constant 0 : index
      %c0_30 = arith.constant 0 : index
      %46 = vector.load %arg9[%c0_29, %c0_30] : memref<8x32xf32, #tpu.memory_space<vmem>>, vector<8x32xf32>
      tpu.vector_store %arg9[%c0_29, %c0_30], %45 {strides = array<i32>} : memref<8x32xf32, #tpu.memory_space<vmem>>, vector<8x32xf32>,
    } else {
    }
    return
  }
  func.func @transform_0(%arg0: i32, %arg1: i32) -> (i32, i32) {
    %c0_i32 = arith.constant 0 : i32
    %c0_i32_0 = arith.constant 0 : i32
    return %arg0, %c0_i32 : i32, i32
  }
  func.func @transform_1(%arg0: i32, %arg1: i32) -> (i32, i32) {
    %c0_i32 = arith.constant 0 : i32
    %c0_i32_0 = arith.constant 0 : i32
    return %c0_i32, %arg1 : i32, i32
  }
  func.func @transform_2(%arg0: i32, %arg1: i32) -> (i32, i32) {
    %c0_i32 = arith.constant 0 : i32
    %c0_i32_0 = arith.constant 0 : i32
    return %c0_i32, %arg1 : i32, i32
  }
  func.func @transform_3(%arg0: i32, %arg1: i32) -> (i32, i32) {
    %c0_i32 = arith.constant 0 : i32
    %c0_i32_0 = arith.constant 0 : i32
    return %arg1, %c0_i32 : i32, i32
  }
  func.func @transform_4(%arg0: i32, %arg1: i32) -> (i32, i32) {
    %c0_i32 = arith.constant 0 : i32
    %c0_i32_0 = arith.constant 0 : i32
    %c0_i32_1 = arith.constant 0 : i32
    return %c0_i32, %c0_i32_0 : i32, i32
  }
  func.func @transform_5(%arg0: i32, %arg1: i32) -> (i32, i32) {
    %c0_i32 = arith.constant 0 : i32
    %c0_i32_0 = arith.constant 0 : i32
    %c0_i32_1 = arith.constant 0 : i32
    return %c0_i32, %c0_i32_0 : i32, i32
  }
  func.func @transform_6(%arg0: i32, %arg1: i32) -> (i32, i32) {
    %c0_i32 = arith.constant 0 : i32
    %c0_i32_0 = arith.constant 0 : i32
    %c0_i32_1 = arith.constant 0 : i32
    return %c0_i32, %c0_i32_0 : i32, i32
  }
  func.func @transform_7(%arg0: i32, %arg1: i32) -> (i32, i32) {
    %c0_i32 = arith.constant 0 : i32
    %c0_i32_0 = arith.constant 0 : i32
    return %arg0, %c0_i32 : i32, i32
  }
}

</mosaic_0001>

<bundles_post_ra>
// kernel: transformer_decoder_forward.19
= control target key start
LH: loop header
LB: loop body
LE: loop exit
PB: predicated region body
PF: predicated region fallthrough
CT: control target
= control target key end

     0   :  { %s512_s12 = smov 0   ;;  %s514_s13 = smov 0   ;;  %s560_s0 = inlined_call_operand.vmem [shape: f32[16,32], index: 0, kind: input, shape index: {}]   ;;  %s561_s1 = inlined_call_operand.vmem [shape: f32[32,32], index: 1, kind: input, shape index: {}]   ;;  %s562_s2 = inlined_call_operand.vmem [shape: f32[1,32], index: 2, kind: input, shape index: {}]   ;;  %s563_s3 = inlined_call_operand.vmem [shape: f32[16,32], index: 3, kind: output, shape index: {}]  }
   0x1   :  { %s516_s14 = smov 0  }
   0x2 LB: > { %s25_s15 = sadd.s32 1, %s483_s13  ;;  %p409_p0 = scmp.ge.s32.totalorder %s487_s14, 1  ;;  %s487_s14 = sphi %s516_s14, %s13_s14   ;;  %s483_s13 = sphi %s514_s13, %s565_s13   ;;  %s479_s12 = sphi %s512_s12, %s564_s12  }
   0x3   : > { %p27_p1 = scmp.ge.s32.totalorder %s25_s15, 2  ;;  %p167_p2 = scmp.lt.s32.totalorder %s487_s14, 3 }
   0x5   : > { %s567_s15 = smov (%p27_p1, %s25_s15), 0  ;;  %p168_p3 = pnand %p409_p0, %p167_p2 }
   0x6   : > { %v218_v0 = vld [vmem:[%s561_s1] sm:$0xff] (!%p168_p3)  ;;  %v219_v1 = vld [vmem:[%s561_s1 + $0x8] sm:$0xff] (!%p168_p3)  ;;  %v220_v2 = vld [vmem:[%s561_s1 + $0x10] sm:$0xff] (!%p168_p3)  ;;  %v489_v3 = vmov (!%p168_p3), 0.0|0.0   ;;  %vm490_vm0 = vmmov (!%p168_p3), 0   ;;  %v491_v6 = vmov (!%p168_p3), 0.0  }
   0x7   : > { %171 = sbr.rel (%p168_p3) target bundleno = 233 (0xe9), region = 32  ;;  %432 = vmatprep.subr.bf16.mxu0 (!%p168_p3), %v489_v3  ;;  %v433_v4 = vpack.c.bf16 (!%p168_p3), %v219_v1, %v218_v0  ;;  %v221_v5 = vld [vmem:[%s561_s1 + $0x18] sm:$0xff] (!%p168_p3)  ;;  %429 = vmatprep.mubr.msk.f32.mxu0 (!%p168_p3), %vm490_vm0, %v491_v6  ;;  %p199_p4 = scmp.lt.s32.totalorder (!%p168_p3), %s479_s12, 1  ;;  %vm229_vm1 = vcmask (!%p168_p3), 261120   ;;  %v412_v9 = vld [vmem:[%s562_s2] ss:$0 sm:$0xff] (!%p168_p3) }
   0x8   : > { %v436_v7 = vpack.c.bf16 (!%p168_p3), %v221_v5, %v220_v2 }
   0x9   : > { %434 = vmatpush3.bf16.msra.mxu0 (!%p168_p3), %v433_v4 }
   0xa   : > { %435 = vmatprep.subr.bf16.mxu0 (!%p168_p3), %v489_v3 }
   0xd   : > { %437 = vmatpush3.bf16.msra.mxu0 (!%p168_p3), %v436_v7 }
   0xe   : > { %s569_s12 = smov (!%p199_p4, %s479_s12), 1 }
   0xf   : > { %s410_s24 = sshll.u32 %s569_s12, 3 }
  0x10   : > { %s202_s27 = scalar_lea.vmem %s560_s0, %s410_s24  ;;  %s216_s5 = scalar_lea.vmem %s563_s3, %s410_s24 }
  0x11   : > { %v217_v8 = vld [vmem:[%s202_s27] sm:$0xff] }
  0x12   : > { %430 = vmatmul.mubr.msk.f32.vlgmr.msra.gmra.mrb[0].mxu0 %vm229_vm1, %v217_v8 }
  0xe5   : > { %v299_v10 = vpop.f32.mrb[0].mxu0 }
  0xe6   : > { %v300_v11 = vadd.f32 %v412_v9, %v299_v10  ;;  %v431_v12 = vpop.f32.mrb[1].mxu0 }
  0xe8   : > { %303 = vst.msk [vmem:[%s216_s5] sm:$0xff] %vm229_vm1, %v300_v11 }
  0xe9 PF: > { %s13_s14 = sadd.s32 1, %s487_s14   ;;  %s564_s12 = smov %s483_s13 }
  0xea   : > { %p10_p5 = scmp.ge.s32.totalorder %s13_s14, 4   ;;  %s565_s13 = smov %s567_s15 }
  0xec   :  { %12 = sbr.rel (!%p10_p5) target bundleno = 2 (0x2), region = 68 }

// kernel: transformer_decoder_forward.18
= control target key start
LH: loop header
LB: loop body
LE: loop exit
PB: predicated region body
PF: predicated region fallthrough
CT: control target
= control target key end

     0   :  { %s543_s21 = smov 0   ;;  %s593_s0 = inlined_call_operand.vmem [shape: f32[16,32], index: 0, kind: input, shape index: {}]   ;;  %s594_s1 = inlined_call_operand.vmem [shape: f32[16,32], index: 1, kind: input, shape index: {}]   ;;  %s595_s2 = inlined_call_operand.vmem [shape: f32[32,32], index: 2, kind: input, shape index: {}]   ;;  %s596_s3 = inlined_call_operand.vmem [shape: f32[1,32], index: 3, kind: input, shape index: {}]   ;;  %s597_s4 = inlined_call_operand.vmem [shape: f32[1,32], index: 4, kind: input, shape index: {}]   ;;  %s598_s5 = inlined_call_operand.vmem [shape: f32[1,32], index: 5, kind: input, shape index: {}]   ;;  %s599_s6 = inlined_call_operand.vmem [shape: f32[16,32], index: 6, kind: output, shape index: {}]  }
   0x1 LB: > { %s448_s22 = sadd.s32 4294967295, %s503_s21   ;;  %p452_p0 = scmp.ge.s32.totalorder %s503_s21, 1  ;;  %s503_s21 = sphi %s543_s21, %s16_s21  }
   0x2   : > { %p220_p1 = scmp.lt.s32.totalorder %s503_s21, 3 }
   0x4   : > { %p221_p2 = pnand %p452_p0, %p220_p1 }
   0x5   : > { %v265_v0 = vld [vmem:[%s595_s2] sm:$0xff] (!%p221_p2)  ;;  %v266_v1 = vld [vmem:[%s595_s2 + $0x8] sm:$0xff] (!%p221_p2)  ;;  %v267_v2 = vld [vmem:[%s595_s2 + $0x10] sm:$0xff] (!%p221_p2)  ;;  %v505_v3 = vmov (!%p221_p2), 0.0|0.0   ;;  %vm506_vm0 = vmmov (!%p221_p2), 0   ;;  %v507_v6 = vmov (!%p221_p2), 0.0  }
   0x6   : > { %224 = sbr.rel (%p221_p2) target bundleno = 547 (0x223), region = 44  ;;  %478 = vmatprep.subr.bf16.mxu0 (!%p221_p2), %v505_v3  ;;  %v479_v4 = vpack.c.bf16 (!%p221_p2), %v266_v1, %v265_v0  ;;  %v268_v5 = vld [vmem:[%s595_s2 + $0x18] sm:$0xff] (!%p221_p2)  ;;  %475 = vmatprep.mubr.msk.f32.mxu0 (!%p221_p2), %vm506_vm0, %v507_v6  ;;  %p252_p3 = scmp.lt.s32.totalorder (!%p221_p2), %s448_s22, 1  ;;  %vm276_vm1 = vcmask (!%p221_p2), 261120   ;;  %v456_v9 = vld [vmem:[%s596_s3] ss:$0 sm:$0xff] (!%p221_p2) }
   0x7   : > { %v482_v7 = vpack.c.bf16 (!%p221_p2), %v268_v5, %v267_v2  ;;  %v458_v25 = vld [vmem:[%s597_s4] ss:$0 sm:$0xff] (!%p221_p2) }
   0x8   : > { %480 = vmatpush3.bf16.msra.mxu0 (!%p221_p2), %v479_v4  ;;  %v459_v27 = vld [vmem:[%s598_s5] ss:$0 sm:$0xff] (!%p221_p2) }
   0x9   : > { %481 = vmatprep.subr.bf16.mxu0 (!%p221_p2), %v505_v3 }
   0xc   : > { %483 = vmatpush3.bf16.msra.mxu0 (!%p221_p2), %v482_v7 }
   0xd   : > { %s601_s22 = smov (!%p252_p3, %s448_s22), 1 }
   0xe   : > { %s563_s7 = sshll.u32 %s601_s22, 3 }
   0xf   : > { %s255_s10 = scalar_lea.vmem %s593_s0, %s563_s7  ;;  %s259_s13 = scalar_lea.vmem %s594_s1, %s563_s7 }
  0x10   : > { %v264_v8 = vld [vmem:[%s255_s10] sm:$0xff]  ;;  %s263_s23 = scalar_lea.vmem %s599_s6, %s563_s7 }
  0x11   : > { %476 = vmatmul.mubr.msk.f32.vlgmr.msra.gmra.mrb[0].mxu0 %vm276_vm1, %v264_v8  ;;  %v350_v11 = vld [vmem:[%s259_s13] sm:$0xff] }
  0xe4   : > { %v346_v10 = vpop.f32.mrb[0].mxu0 }
  0xe5   : > { %v347_v12 = vadd.f32 %v456_v9, %v346_v10  ;;  %v477_v13 = vpop.f32.mrb[1].mxu0 }
  0xe7   : > { %v351_v14 = vadd.f32 %v350_v11, %v347_v12 }
  0xe9   : > { %v352_v15 = vsel %vm276_vm1, %v351_v14, 0.0 }
  0xea   : > { %353 = vadd.xlane.f32.xlu0 %v352_v15 }
 0x177   : > { %v354_v16 = vpop.xlane.xlu0 %353 }
 0x178   : > { %v356_v17 = vmul.f32 0.03125, %v354_v16 }
 0x17a   : > { %v357_v18 = vsub.f32 %v351_v14, %v356_v17 }
 0x17c   : > { %v358_v19 = vmul.f32 %v357_v18, %v357_v18 }
 0x17e   : > { %v359_v20 = vsel %vm276_vm1, %v358_v19, 0.0 }
 0x17f   : > { %360 = vadd.xlane.f32.xlu0 %v359_v20 }
 0x20c   : > { %v361_v21 = vpop.xlane.xlu0 %360 }
 0x20d   : > { %v362_v22 = vmul.f32 0.03125, %v361_v21 }
 0x20f   : > { %v363_v23 = vadd.f32 1e-05, %v362_v22 }
 0x211   : > { %495 = vrsqrt.f32 %v363_v23 }
 0x21b   : > { %v496_v24 = vpop.eup %495 }
 0x21c   : > { %v365_v26 = vmul.f32 %v496_v24, %v357_v18 }
 0x21e   : > { %v373_v28 = vmul.f32 %v458_v25, %v365_v26 }
 0x220   : > { %v381_v29 = vadd.f32 %v459_v27, %v373_v28 }
 0x222   : > { %382 = vst.msk [vmem:[%s263_s23] sm:$0xff] %vm276_vm1, %v381_v29 }
 0x223 PF: > { %s16_s21 = sadd.s32 1, %s503_s21  }
 0x224   : > { %p13_p4 = scmp.ge.s32.totalorder %s16_s21, 4  }
 0x226   :  { %15 = sbr.rel (!%p13_p4) target bundleno = 1 (0x1), region = 77 }

// kernel: transformer_decoder_forward.16
= control target key start
LH: loop header
LB: loop body
LE: loop exit
PB: predicated region body
PF: predicated region fallthrough
CT: control target
= control target key end

     0   :  { %s513_s12 = smov 0   ;;  %s515_s13 = smov 0   ;;  %s561_s0 = inlined_call_operand.vmem [shape: f32[16,32], index: 0, kind: input, shape index: {}]   ;;  %s562_s1 = inlined_call_operand.vmem [shape: f32[32,96], index: 1, kind: input, shape index: {}]   ;;  %s563_s2 = inlined_call_operand.vmem [shape: f32[1,96], index: 2, kind: input, shape index: {}]   ;;  %s564_s3 = inlined_call_operand.vmem [shape: f32[16,96], index: 3, kind: output, shape index: {}]  }
   0x1   :  { %s517_s14 = smov 0  }
   0x2 LB: > { %s25_s15 = sadd.s32 1, %s484_s13  ;;  %p410_p0 = scmp.ge.s32.totalorder %s488_s14, 1  ;;  %s488_s14 = sphi %s517_s14, %s13_s14   ;;  %s484_s13 = sphi %s515_s13, %s566_s13   ;;  %s480_s12 = sphi %s513_s12, %s565_s12  }
   0x3   : > { %p27_p1 = scmp.ge.s32.totalorder %s25_s15, 2  ;;  %p167_p2 = scmp.lt.s32.totalorder %s488_s14, 3 }
   0x5   : > { %s568_s15 = smov (%p27_p1, %s25_s15), 0  ;;  %p168_p3 = pnand %p410_p0, %p167_p2 }
   0x6   : > { %v218_v0 = vld [vmem:[%s562_s1] sm:$0xff] (!%p168_p3)  ;;  %v219_v1 = vld [vmem:[%s562_s1 + $0x8] sm:$0xff] (!%p168_p3)  ;;  %v220_v2 = vld [vmem:[%s562_s1 + $0x10] sm:$0xff] (!%p168_p3)  ;;  %v490_v3 = vmov (!%p168_p3), 0.0|0.0   ;;  %vm491_vm0 = vmmov (!%p168_p3), 0   ;;  %v492_v6 = vmov (!%p168_p3), 0.0  }
   0x7   : > { %171 = sbr.rel (%p168_p3) target bundleno = 233 (0xe9), region = 32  ;;  %433 = vmatprep.subr.bf16.mxu0 (!%p168_p3), %v490_v3  ;;  %v434_v4 = vpack.c.bf16 (!%p168_p3), %v219_v1, %v218_v0  ;;  %v221_v5 = vld [vmem:[%s562_s1 + $0x18] sm:$0xff] (!%p168_p3)  ;;  %430 = vmatprep.mubr.msk.f32.mxu0 (!%p168_p3), %vm491_vm0, %v492_v6  ;;  %p199_p4 = scmp.lt.s32.totalorder (!%p168_p3), %s480_s12, 1  ;;  %vm229_vm1 = vcmask (!%p168_p3), 261120   ;;  %v413_v9 = vld [vmem:[%s563_s2] ss:$0 sm:$0xff] (!%p168_p3) }
   0x8   : > { %v437_v7 = vpack.c.bf16 (!%p168_p3), %v221_v5, %v220_v2  ;;  %vm303_vm2 = vcmask (!%p168_p3), 785408  }
   0x9   : > { %435 = vmatpush3.bf16.msra.mxu0 (!%p168_p3), %v434_v4 }
   0xa   : > { %436 = vmatprep.subr.bf16.mxu0 (!%p168_p3), %v490_v3 }
   0xd   : > { %438 = vmatpush3.bf16.msra.mxu0 (!%p168_p3), %v437_v7 }
   0xe   : > { %s570_s12 = smov (!%p199_p4, %s480_s12), 1 }
   0xf   : > { %s411_s24 = sshll.u32 %s570_s12, 3 }
  0x10   : > { %s202_s27 = scalar_lea.vmem %s561_s0, %s411_s24  ;;  %s216_s5 = scalar_lea.vmem %s564_s3, %s411_s24 }
  0x11   : > { %v217_v8 = vld [vmem:[%s202_s27] sm:$0xff] }
  0x12   : > { %431 = vmatmul.mubr.msk.f32.vlgmr.msra.gmra.mrb[0].mxu0 %vm229_vm1, %v217_v8 }
  0xe5   : > { %v299_v10 = vpop.f32.mrb[0].mxu0 }
  0xe6   : > { %v300_v11 = vadd.f32 %v413_v9, %v299_v10  ;;  %v432_v12 = vpop.f32.mrb[1].mxu0 }
  0xe8   : > { %304 = vst.msk [vmem:[%s216_s5] sm:$0xff] %vm303_vm2, %v300_v11 }
  0xe9 PF: > { %s13_s14 = sadd.s32 1, %s488_s14   ;;  %s565_s12 = smov %s484_s13 }
  0xea   : > { %p10_p5 = scmp.ge.s32.totalorder %s13_s14, 4   ;;  %s566_s13 = smov %s568_s15 }
  0xec   :  { %12 = sbr.rel (!%p10_p5) target bundleno = 2 (0x2), region = 68 }

// kernel: transformer_decoder_forward.17
= control target key start
LH: loop header
LB: loop body
LE: loop exit
PB: predicated region body
PF: predicated region fallthrough
CT: control target
= control target key end

     0   :  { %s1007_s6 = smov 0   ;;  %s1101_s0 = inlined_call_operand.vmem [shape: f32[2,8,96], index: 0, kind: input, shape index: {}]   ;;  %s1102_s1 = inlined_call_operand.vmem [shape: f32[2,8,32], index: 1, kind: output, shape index: {}]  }
   0x1 LB: > { %s856_s7 = sadd.s32 4294967295, %s979_s6   ;;  %p860_p0 = scmp.ge.s32.totalorder %s979_s6, 1  ;;  %s979_s6 = sphi %s1007_s6, %s11_s6  }
   0x2   : > { %p86_p1 = scmp.lt.s32.totalorder %s979_s6, 3 }
   0x4   : > { %p87_p2 = pnand %p860_p0, %p86_p1 }
   0x5   : > { %p104_p3 = scmp.lt.s32.totalorder (!%p87_p2), %s856_s7, 1  ;;  %v981_v0 = vmov (!%p87_p2), 0.0   ;;  %vm982_vm0 = vmmov (!%p87_p2), 0   ;;  %s983_s12 = smov (!%p87_p2), 96   ;;  %vm122_vm1 = vcmask (!%p87_p2), 64512   ;;  %v113_v4 = vlaneseq (!%p87_p2) }
   0x6   : > { %90 = sbr.rel (%p87_p2) target bundleno = 1219 (0x4c3), region = 24  ;;  %893 = vmatprep.subr.mxu0 (!%p87_p2), %v981_v0  ;;  %895 = vmatprep.mubr.msk.f32.mxu0 (!%p87_p2), %vm982_vm0, %v981_v0  ;;  %s984_s13 = smov (!%p87_p2), 64   ;;  %vm457_vm3 = vcmask (!%p87_p2), 130112   ;;  %vm629_vm4 = vcmask (!%p87_p2), 195712   ;;  %vm801_vm5 = vcmask (!%p87_p2), 261312  }
   0x7   : > { %898 = vmatprep.subr.mxu1 (!%p87_p2), %v981_v0  ;;  %900 = vmatprep.mubr.msk.f32.mxu1 (!%p87_p2), %vm982_vm0, %v981_v0  ;;  %s985_s14 = smov (!%p87_p2), 88   ;;  %s986_s15 = smov (!%p87_p2), 120   ;;  %v114_v5 = vshrl.u32 (!%p87_p2), %v113_v4, 7  ;;  %v116_v6 = vand.u32 (!%p87_p2), 127, %v113_v4 }
   0x8   : > { %s987_s16 = smov (!%p87_p2), 80   ;;  %s988_s17 = smov (!%p87_p2), 112  }
   0x9   : > { %s989_s18 = smov (!%p87_p2), 72   ;;  %s990_s19 = smov (!%p87_p2), 104   ;;  %vm117_vm2 = vcmp.gt.s32.totalorder (!%p87_p2), %v116_v6, %v114_v5 }
   0xa   : > { %s991_s20 = smov (!%p87_p2), 56   ;;  %s992_s21 = smov (!%p87_p2), 48  }
   0xb   : > { %s993_s22 = smov (!%p87_p2), 40   ;;  %s994_s26 = smov (!%p87_p2), 8  }
   0xc   : > { %s995_s27 = smov (!%p87_p2), 16   ;;  %s996_s28 = smov (!%p87_p2), 24  }
   0xd   : > { %s1104_s7 = smov (!%p104_p3, %s856_s7), 1 }
   0xe   : > { %s861_s8 = sshll.u32 %s1104_s7, 3 }
   0xf   : > { %s107_s11 = scalar_lea.vmem %s1101_s0, %s861_s8  ;;  %s1091_s25 = scalar_lea.vmem %s1102_s1, %s861_s8 }
  0x10   : > { %v1029_v1 = vld [vmem:[%s107_s11] sm:$0xff] }
  0x11   : > { %120 = vrot.lane.b32.xlu0 %v1029_v1, %s983_s12  ;;  %v118_v3 = vmul.f32 0.35355338, %v1029_v1  ;;  %208 = vrot.lane.b32.xlu1 %v1029_v1, %s984_s13 }
  0x15   : > { %289 = vrot.lane.b32.xlu1 %v1029_v1, %s985_s14 }
  0x19   : > { %287 = vrot.lane.b32.xlu1 %v118_v3, %s986_s15 }
  0x1d   : > { %461 = vrot.lane.b32.xlu1 %v1029_v1, %s987_s16 }
  0x21   : > { %459 = vrot.lane.b32.xlu1 %v118_v3, %s988_s17 }
  0x25   : > { %633 = vrot.lane.b32.xlu1 %v1029_v1, %s989_s18 }
  0x29   : > { %631 = vrot.lane.b32.xlu1 %v118_v3, %s990_s19 }
  0x83   : > { %v121_v2 = vpop.permute.xlu0 %120  ;;  %v209_v11 = vpop.permute.xlu1 %208 }
  0x84   : > { %894 = vmatpush3.xpose.msk.msra.mxu0 %vm122_vm1, %v121_v2  ;;  %899 = vmatpush3.msra.mxu1 %v209_v11 }
  0x85   : > { %908 = vmatprep.subr.mxu0 %v981_v0  ;;  %903 = vmatprep.subr.mxu1 %v981_v0 }
  0x87   : > { %896 = vmatmul.mubr.msk.f32.vlgmr.msra.gmra.mrb[0].mxu0 %vm122_vm1, %v118_v3  ;;  %v290_v12 = vpop.permute.xlu1 %289 }
  0x88   : > { %910 = vmatprep.mubr.msk.f32.mxu0 %vm982_vm0, %v981_v0 }
  0x8b   : > { %v288_v15 = vpop.permute.xlu1 %287 }
  0x8f   : > { %v462_v17 = vpop.permute.xlu1 %461 }
  0x93   : > { %v460_v18 = vpop.permute.xlu1 %459 }
  0x97   : > { %v634_v20 = vpop.permute.xlu1 %633 }
  0x9b   : > { %v632_v21 = vpop.permute.xlu1 %631 }
 0x15a   : > { %v194_v7 = vpop.f32.mrb[0].mxu0 }
 0x15b   : > { %v198_v8 = vsel %vm117_vm2, -1e+09, %v194_v7  ;;  %v897_v9 = vpop.f32.mrb[1].mxu0 }
 0x15c   : > { %v199_v10 = vsel %vm122_vm1, %v198_v8, -inf }
 0x15d   : > { %200 = vmax.xlane.f32.xlu0 %v199_v10 }
 0x173   : > { %375 = vrot.lane.b32.xlu0 %v1029_v1, %s991_s20 }
 0x1ea   : > { %v201_v13 = vpop.xlane.xlu0 %200 }
 0x1eb   : > { %v202_v14 = vsub.f32 %v198_v8, %v201_v13 }
 0x1ed   : > { %v203_v16 = vmul.f32 1.442695, %v202_v14 }
 0x1ee   : > { %v376_v22 = vpop.permute.xlu0 %375 }
 0x1ef   : > { %957 = vpow2.f32 %v203_v16  ;;  %909 = vmatpush3.msra.mxu0 %v376_v22 }
 0x1f0   : > { %918 = vmatprep.subr.mxu0 %v981_v0 }
 0x1f9   : > { %v1046_v19 = vpop.eup %957 }
 0x1fa   : > { %901 = vmatmul.mubr.msk.f32.vlgmr.msra.gmra.mrb[0].mxu1 %vm122_vm1, %v1046_v19  ;;  %v205_v54 = vsel %vm122_vm1, %v1046_v19, 0.0 }
 0x1fb   : > { %904 = vmatpush3.xpose.msk.msra.mxu1 %vm122_vm1, %v290_v12  ;;  %905 = vmatprep.mubr.msk.f32.mxu1 %vm982_vm0, %v981_v0 }
 0x1fc   : > { %913 = vmatprep.subr.mxu1 %v981_v0 }
 0x1fe   : > { %906 = vmatmul.mubr.msk.f32.vlgmr.msra.gmra.mrb[2].mxu1 %vm122_vm1, %v288_v15 }
 0x1ff   : > { %914 = vmatpush3.xpose.msk.msra.mxu1 %vm122_vm1, %v462_v17  ;;  %915 = vmatprep.mubr.msk.f32.mxu1 %vm982_vm0, %v981_v0 }
 0x200   : > { %923 = vmatprep.subr.mxu1 %v981_v0 }
 0x202   : > { %916 = vmatmul.mubr.msk.f32.vlgmr.msra.gmra.mrb[4].mxu1 %vm122_vm1, %v460_v18 }
 0x203   : > { %924 = vmatpush3.xpose.msk.msra.mxu1 %vm122_vm1, %v634_v20  ;;  %925 = vmatprep.mubr.msk.f32.mxu1 %vm982_vm0, %v981_v0 }
 0x206   : > { %926 = vmatmul.mubr.msk.f32.vlgmr.msra.gmra.mrb[6].mxu1 %vm122_vm1, %v632_v21 }
 0x2cd   : > { %v280_v23 = vpop.f32.mrb[0].mxu1 }
 0x2ce   : > { %v902_v24 = vpop.f32.mrb[1].mxu1 }
 0x2d1   : > { %v361_v25 = vpop.f32.mrb[2].mxu1 }
 0x2d2   : > { %v365_v26 = vsel %vm117_vm2, -1e+09, %v361_v25  ;;  %v907_v27 = vpop.f32.mrb[3].mxu1 }
 0x2d3   : > { %v366_v28 = vsel %vm122_vm1, %v365_v26, -inf }
 0x2d4   : > { %367 = vmax.xlane.f32.xlu1 %v366_v28 }
 0x2d5   : > { %v533_v29 = vpop.f32.mrb[4].mxu1 }
 0x2d6   : > { %v537_v30 = vsel %vm117_vm2, -1e+09, %v533_v29  ;;  %v917_v31 = vpop.f32.mrb[5].mxu1 }
 0x2d7   : > { %v538_v32 = vsel %vm122_vm1, %v537_v30, -inf }
 0x2d8   : > { %539 = vmax.xlane.f32.xlu0 %v538_v32 }
 0x2d9   : > { %v705_v33 = vpop.f32.mrb[6].mxu1 }
 0x2da   : > { %v709_v34 = vsel %vm117_vm2, -1e+09, %v705_v33  ;;  %v927_v35 = vpop.f32.mrb[7].mxu1 }
 0x2db   : > { %v710_v36 = vsel %vm122_vm1, %v709_v34, -inf }
 0x2dc   : > { %711 = vmax.xlane.f32.xlu0 %v710_v36 }
 0x2e5   : > { %547 = vrot.lane.b32.xlu1 %v1029_v1, %s992_s21 }
 0x2f2   : > { %719 = vrot.lane.b32.xlu0 %v1029_v1, %s993_s22 }
 0x361   : > { %v368_v37 = vpop.xlane.xlu1 %367 }
 0x362   : > { %v369_v38 = vsub.f32 %v365_v26, %v368_v37 }
 0x364   : > { %v370_v39 = vmul.f32 1.442695, %v369_v38 }
 0x365   : > { %v540_v40 = vpop.xlane.xlu0 %539  ;;  %v548_v46 = vpop.permute.xlu1 %547 }
 0x366   : > { %959 = vpow2.f32 %v370_v39  ;;  %v541_v41 = vsub.f32 %v537_v30, %v540_v40 }
 0x368   : > { %v542_v42 = vmul.f32 1.442695, %v541_v41 }
 0x369   : > { %v712_v43 = vpop.xlane.xlu0 %711 }
 0x36a   : > { %961 = vpow2.f32 %v542_v42  ;;  %v713_v44 = vsub.f32 %v709_v34, %v712_v43 }
 0x36c   : > { %v714_v45 = vmul.f32 1.442695, %v713_v44 }
 0x36d   : > { %v720_v49 = vpop.permute.xlu0 %719 }
 0x36e   : > { %963 = vpow2.f32 %v714_v45 }
 0x370   : > { %v960_v47 = vpop.eup %959 }
 0x371   : > { %911 = vmatmul.mubr.msk.f32.vlgmr.msra.gmra.mrb[2].mxu0 %vm122_vm1, %v960_v47  ;;  %v372_v48 = vsel %vm122_vm1, %v960_v47, 0.0 }
 0x372   : > { %919 = vmatpush3.msra.mxu0 %v548_v46  ;;  %373 = vadd.xlane.f32.xlu0 %v372_v48 }
 0x373   : > { %920 = vmatprep.mubr.msk.f32.mxu0 %vm982_vm0, %v981_v0  ;;  %928 = vmatprep.subr.mxu0 %v981_v0 }
 0x374   : > { %v962_v50 = vpop.eup %961 }
 0x375   : > { %921 = vmatmul.mubr.msk.f32.vlgmr.msra.gmra.mrb[4].mxu0 %vm122_vm1, %v962_v50  ;;  %v544_v51 = vsel %vm122_vm1, %v962_v50, 0.0 }
 0x376   : > { %929 = vmatpush3.msra.mxu0 %v720_v49  ;;  %545 = vadd.xlane.f32.xlu1 %v544_v51 }
 0x377   : > { %930 = vmatprep.mubr.msk.f32.mxu0 %vm982_vm0, %v981_v0 }
 0x378   : > { %v964_v52 = vpop.eup %963 }
 0x379   : > { %931 = vmatmul.mubr.msk.f32.vlgmr.msra.gmra.mrb[6].mxu0 %vm122_vm1, %v964_v52  ;;  %v716_v53 = vsel %vm122_vm1, %v964_v52, 0.0 }
 0x37a   : > { %717 = vadd.xlane.f32.xlu0 %v716_v53 }
 0x37e   : > { %206 = vadd.xlane.f32.xlu0 %v205_v54 }
 0x3ff   : > { %v374_v55 = vpop.xlane.xlu0 %373 }
 0x403   : > { %v546_v60 = vpop.xlane.xlu1 %545 }
 0x407   : > { %v718_v56 = vpop.xlane.xlu0 %717 }
 0x40b   : > { %v207_v57 = vpop.xlane.xlu0 %206 }
 0x40c   : > { %965 = vrcp.f32 %v207_v57 }
 0x40d   : > { %967 = vrcp.f32 %v374_v55 }
 0x40e   : > { %969 = vrcp.f32 %v546_v60 }
 0x40f   : > { %971 = vrcp.f32 %v718_v56 }
 0x416   : > { %v966_v58 = vpop.eup %965 }
 0x417   : > { %v285_v59 = vmul.f32 %v966_v58, %v280_v23  ;;  %v968_v61 = vpop.eup %967 }
 0x418   : > { %v970_v1 = vpop.eup %969 }
 0x419   : > { %286 = vst.msk [vmem:[%s1091_s25] sm:$0xff] %vm122_vm1, %v285_v59  ;;  %v972_v5 = vpop.eup %971 }
 0x444   : > { %v447_v62 = vpop.f32.mrb[2].mxu0 }
 0x445   : > { %v452_v63 = vmul.f32 %v968_v61, %v447_v62  ;;  %v912_v0 = vpop.f32.mrb[3].mxu0 }
 0x447   : > { %454 = vrot.lane.b32.xlu0 %v452_v63, %s994_s26 }
 0x448   : > { %v619_v2 = vpop.f32.mrb[4].mxu0 }
 0x449   : > { %v624_v3 = vmul.f32 %v970_v1, %v619_v2  ;;  %v922_v4 = vpop.f32.mrb[5].mxu0 }
 0x44b   : > { %626 = vrot.lane.b32.xlu1 %v624_v3, %s995_s27 }
 0x44c   : > { %v791_v6 = vpop.f32.mrb[6].mxu0 }
 0x44d   : > { %v796_v7 = vmul.f32 %v972_v5, %v791_v6  ;;  %v932_v8 = vpop.f32.mrb[7].mxu0 }
 0x44f   : > { %798 = vrot.lane.b32.xlu0 %v796_v7, %s996_s28 }
 0x4b9   : > { %v455_v9 = vpop.permute.xlu0 %454 }
 0x4ba   : > { %458 = vst.msk [vmem:[%s1091_s25] sm:$0xff] %vm457_vm3, %v455_v9 }
 0x4bd   : > { %v627_v10 = vpop.permute.xlu1 %626 }
 0x4be   : > { %630 = vst.msk [vmem:[%s1091_s25] sm:$0xff] %vm629_vm4, %v627_v10 }
 0x4c1   : > { %v799_v11 = vpop.permute.xlu0 %798 }
 0x4c2   : > { %802 = vst.msk [vmem:[%s1091_s25] sm:$0xff] %vm801_vm5, %v799_v11 }
 0x4c3 PF: > { %s11_s6 = sadd.s32 1, %s979_s6  }
 0x4c4   : > { %p8_p4 = scmp.ge.s32.totalorder %s11_s6, 4  }
 0x4c6   :  { %10 = sbr.rel (!%p8_p4) target bundleno = 1 (0x1), region = 54 }

// kernel: transformer_decoder_forward.20
= control target key start
LH: loop header
LB: loop body
LE: loop exit
PB: predicated region body
PF: predicated region fallthrough
CT: control target
= control target key end

     0   :  { %s513_s12 = smov 0   ;;  %s515_s13 = smov 0   ;;  %s561_s0 = inlined_call_operand.vmem [shape: f32[16,32], index: 0, kind: input, shape index: {}]   ;;  %s562_s1 = inlined_call_operand.vmem [shape: f32[32,64], index: 1, kind: input, shape index: {}]   ;;  %s563_s2 = inlined_call_operand.vmem [shape: f32[1,64], index: 2, kind: input, shape index: {}]   ;;  %s564_s3 = inlined_call_operand.vmem [shape: f32[16,64], index: 3, kind: output, shape index: {}]  }
   0x1   :  { %s517_s14 = smov 0  }
   0x2 LB: > { %s25_s15 = sadd.s32 1, %s484_s13  ;;  %p410_p0 = scmp.ge.s32.totalorder %s488_s14, 1  ;;  %s488_s14 = sphi %s517_s14, %s13_s14   ;;  %s484_s13 = sphi %s515_s13, %s566_s13   ;;  %s480_s12 = sphi %s513_s12, %s565_s12  }
   0x3   : > { %p27_p1 = scmp.ge.s32.totalorder %s25_s15, 2  ;;  %p167_p2 = scmp.lt.s32.totalorder %s488_s14, 3 }
   0x5   : > { %s568_s15 = smov (%p27_p1, %s25_s15), 0  ;;  %p168_p3 = pnand %p410_p0, %p167_p2 }
   0x6   : > { %v218_v0 = vld [vmem:[%s562_s1] sm:$0xff] (!%p168_p3)  ;;  %v219_v1 = vld [vmem:[%s562_s1 + $0x8] sm:$0xff] (!%p168_p3)  ;;  %v220_v2 = vld [vmem:[%s562_s1 + $0x10] sm:$0xff] (!%p168_p3)  ;;  %v490_v3 = vmov (!%p168_p3), 0.0|0.0   ;;  %vm491_vm0 = vmmov (!%p168_p3), 0   ;;  %v492_v6 = vmov (!%p168_p3), 0.0  }
   0x7   : > { %171 = sbr.rel (%p168_p3) target bundleno = 233 (0xe9), region = 32  ;;  %433 = vmatprep.subr.bf16.mxu0 (!%p168_p3), %v490_v3  ;;  %v434_v4 = vpack.c.bf16 (!%p168_p3), %v219_v1, %v218_v0  ;;  %v221_v5 = vld [vmem:[%s562_s1 + $0x18] sm:$0xff] (!%p168_p3)  ;;  %430 = vmatprep.mubr.msk.f32.mxu0 (!%p168_p3), %vm491_vm0, %v492_v6  ;;  %p199_p4 = scmp.lt.s32.totalorder (!%p168_p3), %s480_s12, 1  ;;  %vm229_vm1 = vcmask (!%p168_p3), 261120   ;;  %v413_v9 = vld [vmem:[%s563_s2] ss:$0 sm:$0xff] (!%p168_p3) }
   0x8   : > { %v437_v7 = vpack.c.bf16 (!%p168_p3), %v221_v5, %v220_v2  ;;  %vm303_vm2 = vcmask (!%p168_p3), 523264  }
   0x9   : > { %435 = vmatpush3.bf16.msra.mxu0 (!%p168_p3), %v434_v4 }
   0xa   : > { %436 = vmatprep.subr.bf16.mxu0 (!%p168_p3), %v490_v3 }
   0xd   : > { %438 = vmatpush3.bf16.msra.mxu0 (!%p168_p3), %v437_v7 }
   0xe   : > { %s570_s12 = smov (!%p199_p4, %s480_s12), 1 }
   0xf   : > { %s411_s24 = sshll.u32 %s570_s12, 3 }
  0x10   : > { %s202_s27 = scalar_lea.vmem %s561_s0, %s411_s24  ;;  %s216_s5 = scalar_lea.vmem %s564_s3, %s411_s24 }
  0x11   : > { %v217_v8 = vld [vmem:[%s202_s27] sm:$0xff] }
  0x12   : > { %431 = vmatmul.mubr.msk.f32.vlgmr.msra.gmra.mrb[0].mxu0 %vm229_vm1, %v217_v8 }
  0xe5   : > { %v299_v10 = vpop.f32.mrb[0].mxu0 }
  0xe6   : > { %v300_v11 = vadd.f32 %v413_v9, %v299_v10  ;;  %v432_v12 = vpop.f32.mrb[1].mxu0 }
  0xe8   : > { %304 = vst.msk [vmem:[%s216_s5] sm:$0xff] %vm303_vm2, %v300_v11 }
  0xe9 PF: > { %s13_s14 = sadd.s32 1, %s488_s14   ;;  %s565_s12 = smov %s484_s13 }
  0xea   : > { %p10_p5 = scmp.ge.s32.totalorder %s13_s14, 4   ;;  %s566_s13 = smov %s568_s15 }
  0xec   :  { %12 = sbr.rel (!%p10_p5) target bundleno = 2 (0x2), region = 68 }

// kernel: transformer_decoder_forward.31
= control target key start
LH: loop header
LB: loop body
LE: loop exit
PB: predicated region body
PF: predicated region fallthrough
CT: control target
= control target key end

     0   :  { %12 = vsyncpa [#allocation4], 0  ;;  %s1116_s0 = inlined_call_operand.vmem [shape: f32[16,32], index: 0, kind: input, shape index: {}]   ;;  %s1117_s1 = inlined_call_operand.vmem [shape: f32[32,64], index: 1, kind: input, shape index: {}]   ;;  %s1118_s2 = inlined_call_operand.vmem [shape: f32[1,64], index: 2, kind: input, shape index: {}]   ;;  %s1119_s3 = inlined_call_operand.vmem [shape: f32[64,32], index: 3, kind: input, shape index: {}]   ;;  %s1120_s4 = inlined_call_operand.vmem [shape: f32[1,32], index: 4, kind: input, shape index: {}]   ;;  %s1121_s5 = inlined_call_operand.vmem [shape: f32[1,32], index: 5, kind: input, shape index: {}]   ;;  %s1122_s6 = inlined_call_operand.vmem [shape: f32[1,32], index: 6, kind: input, shape index: {}]   ;;  %s1123_s7 = inlined_call_operand.hbm [shape: f32[16,32], index: 7, kind: output, shape index: {}]  }
   0x1   :  { %14 = vsyncpa [#allocation4 + $0x1], 0  ;;  %s950_s24 = smov 0   ;;  %s952_s25 = smov 0  }
   0x2   :  { %s954_s26 = smov 0   ;;  %s956_s27 = smov 0  }
   0x3   :  { %s958_s28 = smov 0   ;;  %s960_s29 = smov 0  }
   0x4 LB: > { %s684_s30 = sadd.s32 4294967295, %s904_s29   ;;  %s685_s8 = sadd.s32 4294967294, %s904_s29   ;;  %s904_s29 = sphi %s960_s29, %s20_s29   ;;  %s900_s28 = sphi %s958_s28, %s1130_s28   ;;  %s896_s27 = sphi %s956_s27, %s1129_s27   ;;  %s892_s26 = sphi %s954_s26, %s1128_s26   ;;  %s888_s25 = sphi %s952_s25, %s1127_s25   ;;  %s884_s24 = sphi %s950_s24, %s1126_s24  }
   0x5   : > { %s32_s9 = sadd.s32 1, %s900_s28  ;;  %s206_s10 = sadd.s32 1, %s892_s26 }
   0x6   : > { %p34_p0 = scmp.ge.s32.totalorder %s32_s9, 2  ;;  %p216_p1 = scmp.ne.s32.totalorder %s892_s26, %s888_s25 }
   0x7   : > { %p217_p2 = scmp.eq.s32.totalorder %s684_s30, 1  ;;  %p222_p3 = scmp.ne.s32.totalorder %s888_s25, %s884_s24 }
   0x8   : > { %s1132_s9 = smov (%p34_p0, %s32_s9), 0  ;;  %p223_p5 = scmp.eq.s32.totalorder %s685_s8, 1 }
   0x9   : > { %p990_p4 = por %p217_p2, %p216_p1  ;;  %s203_s12 = ssub.s32 %s900_s28, %s1132_s9 }
   0xa   : > { %p691_p6 = scmp.ge.s32.totalorder %s904_s29, 1  ;;  %p204_p7 = scmp.eq.s32.totalorder %s203_s12, 0 }
   0xb   : > { %p997_p8 = por %p223_p5, %p222_p3  ;;  %p279_p9 = scmp.lt.s32.totalorder %s904_s29, 3 }
   0xc   : > { %s1003_s14 = scalar_select %p204_p7, %s892_s26, %s206_s10  }
   0xd   : > { %p280_p10 = pnand %p691_p6, %p279_p9 }
   0xe   : > { %v346_v0 = vld [vmem:[%s1117_s1] sm:$0xff] (!%p280_p10)  ;;  %v347_v1 = vld [vmem:[%s1117_s1 + $0x8] sm:$0xff] (!%p280_p10)  ;;  %v348_v2 = vld [vmem:[%s1117_s1 + $0x10] sm:$0xff] (!%p280_p10)  ;;  %vm343_vm0 = vcmask (!%p280_p10), 261120   ;;  %v906_v3 = vmov (!%p280_p10), 0.0|0.0   ;;  %v907_v6 = vmov (!%p280_p10), 0.0  }
   0xf   : > { %283 = sbr.rel (%p280_p10) target bundleno = 796 (0x31c), region = 48  ;;  %748 = vmatprep.subr.bf16.mxu0 (!%p280_p10), %v906_v3  ;;  %v749_v4 = vpack.c.bf16 (!%p280_p10), %v347_v1, %v346_v0  ;;  %v349_v5 = vld [vmem:[%s1117_s1 + $0x18] sm:$0xff] (!%p280_p10)  ;;  %344 = vst.msk [vmem:[#allocation2] sm:$0xff] (!%p280_p10), %vm343_vm0, %v907_v6  ;;  %p322_p11 = scmp.lt.s32.totalorder (!%p280_p10), %s896_s27, 1  ;;  %754 = vmatprep.subr.bf16.mxu1 (!%p280_p10), %v906_v3  ;;  %v433_v7 = vld [vmem:[%s1119_s3] sm:$0xff] (!%p280_p10)  ;;  %v434_v8 = vld [vmem:[%s1119_s3 + $0x8] sm:$0xff] (!%p280_p10) }
  0x10   : > { %vm908_vm1 = vmmov (!%p280_p10), 0   ;;  %v755_v9 = vpack.c.bf16 (!%p280_p10), %v434_v8, %v433_v7  ;;  %v435_v10 = vld [vmem:[%s1119_s3 + $0x10] sm:$0xff] (!%p280_p10)  ;;  %v436_v11 = vld [vmem:[%s1119_s3 + $0x18] sm:$0xff] (!%p280_p10)  ;;  %v752_v12 = vpack.c.bf16 (!%p280_p10), %v349_v5, %v348_v2  ;;  %v437_v14 = vld [vmem:[%s1119_s3 + $0x20] sm:$0xff] (!%p280_p10)  ;;  %vm441_vm2 = vcmask (!%p280_p10), 523264   ;;  %s319_s22 = sand.u32 (!%p280_p10), 1, %s888_s25  }
  0x11   : > { %726 = vmatprep.mubr.msk.f32.mxu0 (!%p280_p10), %vm908_vm1, %v907_v6  ;;  %745 = vmatprep.mubr.msk.f32.mxu1 (!%p280_p10), %vm908_vm1, %v907_v6  ;;  %v758_v13 = vpack.c.bf16 (!%p280_p10), %v436_v11, %v435_v10  ;;  %v438_v15 = vld [vmem:[%s1119_s3 + $0x28] sm:$0xff] (!%p280_p10)  ;;  %v439_v18 = vld [vmem:[%s1119_s3 + $0x30] sm:$0xff] (!%p280_p10)  ;;  %v440_v19 = vld [vmem:[%s1119_s3 + $0x38] sm:$0xff] (!%p280_p10)  ;;  %s692_s23 = sshll.u32 (!%p280_p10), %s319_s22, 3  ;;  %s701_s15 = sshll.u32 (!%p280_p10), %s896_s27, 7 }
  0x12   : > { %750 = vmatpush3.bf16.msra.mxu0 (!%p280_p10), %v749_v4  ;;  %756 = vmatpush3.bf16.msra.mxu1 (!%p280_p10), %v755_v9  ;;  %v761_v17 = vpack.c.bf16 (!%p280_p10), %v438_v15, %v437_v14  ;;  %v764_v20 = vpack.c.bf16 (!%p280_p10), %v440_v19, %v439_v18  ;;  %v694_v21 = vld [vmem:[%s1118_s2] ss:$0 sm:$0xff] (!%p280_p10)  ;;  %s321_s16 = scalar_lea.vmem (!%p280_p10), [#allocation3], %s692_s23  ;;  %s1068_s20 = scalar_lea.hbm (!%p280_p10), %s1123_s7, %s701_s15 }
  0x13   : > { %751 = vmatprep.subr.bf16.mxu0 (!%p280_p10), %v906_v3  ;;  %757 = vmatprep.subr.bf16.mxu1 (!%p280_p10), %v906_v3  ;;  %v697_v30 = vld [vmem:[%s1120_s4] ss:$0 sm:$0xff] (!%p280_p10)  ;;  %s575_s17 = sshll.u32 (!%p280_p10), %s321_s16, 4  ;;  %s562_s21 = scalar_lea.sflag (!%p280_p10), [#allocation4], %s319_s22  ;;  %s1070_s17 = int_to_ptr.vmem [resolvable:$true] %s575_s17 }
  0x14   : > { %v698_v44 = vld [vmem:[%s1121_s5] ss:$0 sm:$0xff] (!%p280_p10)  ;;  %s826_s30 = scalar_lea.vmem (!%p280_p10), %s1070_s17, 128 }
  0x15   : > { %v699_v46 = vld [vmem:[%s1122_s6] ss:$0 sm:$0xff] (!%p280_p10)  ;;  %p827_p12 = scmp.ne.s32.totalorder (!%p280_p10), %s1070_s17, %s826_s30 }
  0x16   : > { %s323_s18 = scalar_select %p322_p11, %s896_s27, 1  ;;  %753 = vmatpush3.bf16.msra.mxu0 %v752_v12  ;;  %759 = vmatpush3.bf16.msra.mxu1 %v758_v13  ;;  %v432_v26 = vld [vmem:[#allocation2] sm:$0xff] }
  0x17   : > { %760 = vmatprep.subr.bf16.mxu1 %v906_v3  ;;  %p828_p13 = pnand %p827_p12, %p990_p4  ;;  %s909_s27 = smov [#allocation3]  }
  0x18   : > { %s693_s19 = sshll.u32 %s323_s18, 3  ;;  %s830_s23 = sshll.u32 %s909_s27, 4  ;;  %s831_s23 = int_to_ptr.vmem [resolvable:$false] %s830_s23 }
  0x19   : > { %s325_s10 = scalar_lea.vmem %s1116_s0, %s693_s19  ;;  %p829_p0 = pneg %p828_p13 }
  0x1a   : > { %v345_v16 = vld [vmem:[%s325_s10] sm:$0xff]  ;;  %762 = vmatpush3.bf16.msra.mxu1 %v761_v17  ;;  %s832_s8 = scalar_lea.vmem %s831_s23, 256  ;;  %p833_p1 = scmp.lt.s32.totalorder %s1070_s17, %s831_s23 }
  0x1b   : > { %727 = vmatmul.mubr.msk.f32.vlgmr.msra.gmra.mrb[0].mxu0 %vm343_vm0, %v345_v16  ;;  %763 = vmatprep.subr.bf16.mxu1 %v906_v3  ;;  %p834_p2 = scmp.lt.s32.totalorder %s832_s8, %s826_s30 }
  0x1d   : > { %p835_p3 = por %p834_p2, %p833_p1 }
  0x1e   : > { %765 = vmatpush3.bf16.msra.mxu1 %v764_v20 }
  0x1f   : > { %p836_p5 = pnand %p835_p3, %p829_p0 }
  0xee   : > { %v427_v22 = vpop.f32.mrb[0].mxu0 }
  0xef   : > { %v428_v23 = vadd.f32 %v694_v21, %v427_v22  ;;  %v728_v24 = vpop.f32.mrb[1].mxu0 }
  0xf1   : > { %v431_v25 = vmax.f32 %v428_v23, 0.0 }
  0xf3   : > { %746 = vmatmul.mubr.msk.f32.vlgmr.msra.gmra.mrb[0].mxu1 %vm441_vm2, %v431_v25 }
 0x1c6   : > { %v511_v27 = vpop.f32.mrb[0].mxu1 }
 0x1c7   : > { %v515_v28 = vadd.f32 %v511_v27, %v432_v26  ;;  %v747_v29 = vpop.f32.mrb[1].mxu1 }
 0x1c9   : > { %516 = vst.msk [vmem:[#allocation2] sm:$0xff] %vm343_vm0, %v515_v28 }
 0x1d0   : > { %v520_v31 = vld [vmem:[#allocation2] sm:$0xff] }
 0x1d1   : > { %v528_v32 = vadd.f32 %v697_v30, %v520_v31 }
 0x1d3   : > { %v529_v33 = vadd.f32 %v528_v32, %v345_v16 }
 0x1d5   : > { %v530_v34 = vsel %vm343_vm0, %v529_v33, 0.0 }
 0x1d6   : > { %531 = vadd.xlane.f32.xlu0 %v530_v34 }
 0x263   : > { %v532_v35 = vpop.xlane.xlu0 %531 }
 0x264   : > { %v534_v36 = vmul.f32 0.03125, %v532_v35 }
 0x266   : > { %v535_v37 = vsub.f32 %v529_v33, %v534_v36 }
 0x268   : > { %v536_v38 = vmul.f32 %v535_v37, %v535_v37 }
 0x26a   : > { %v537_v39 = vsel %vm343_vm0, %v536_v38, 0.0 }
 0x26b   : > { %538 = vadd.xlane.f32.xlu0 %v537_v39 }
 0x2f8   : > { %v539_v40 = vpop.xlane.xlu0 %538 }
 0x2f9   : > { %v540_v41 = vmul.f32 0.03125, %v539_v40 }
 0x2fb   : > { %v541_v42 = vadd.f32 1e-05, %v540_v41 }
 0x2fd   : > { %824 = vrsqrt.f32 %v541_v42 }
 0x307   : > { %v825_v43 = vpop.eup %824 }
 0x308   : > { %v543_v45 = vmul.f32 %v825_v43, %v535_v37 }
 0x30a   : > { %v551_v47 = vmul.f32 %v698_v44, %v543_v45 }
 0x30c   : > { %v559_v48 = vadd.f32 %v699_v46, %v551_v47 }
 0x30e   : > { %560 = vst.msk [vmem:[%s321_s16] sm:$0xff] %vm343_vm0, %v559_v48 }
 0x30f   : > { %839 = shalt.err (!%p836_p5)
}
 0x310   : > { %s840_s22 = scalar_lea.hbm %s1068_s20, 128  ;;  %s844_s15 = scalar_lea.hbm %s1123_s7, 256 }
 0x311   : > { %p841_p6 = scmp.ne.s32.totalorder %s1068_s20, %s840_s22  ;;  %p845_p10 = scmp.lt.u32.totalorder %s1068_s20, %s1123_s7 }
 0x312   : > { %p846_p11 = scmp.lt.u32.totalorder %s844_s15, %s840_s22  ;;  %p848_p13 = scmp.lt.u32.totalorder %s840_s22, %s1068_s20 }
 0x313   : > { %p842_p7 = pnand %p841_p6, %p990_p4 }
 0x314   : > { %p847_p12 = por %p846_p11, %p845_p10 }
 0x315   : > { %p843_p9 = pneg %p842_p7 }
 0x316   : > { %p849_p0 = por %p848_p13, %p847_p12 }
 0x318   : > { %p850_p1 = pnand %p849_p0, %p843_p9 }
 0x31a   : > { %853 = shalt.err (!%p850_p1)
}
 0x31b   : > { %766 = dma.vmem_to_hbm [thread:$0]  (%p990_p4), %s1070_s17, 128, %s1068_s20, %s562_s21  }
 0x31c PF: > { %p772_p2 = scmp.ge.s32.totalorder %s904_s29, 2  ;;  %s587_s19 = sand.u32 1, %s884_s24  }
 0x31d   : > { %s588_s30 = scalar_lea.sflag [#allocation4], %s587_s19 }
 0x31e   : > { %p769_p3 = pnand %p772_p2, %p997_p8 }
 0x320   : > { %879 = dma.done.wait (!%p769_p3), %s588_s30, 128  }
 0x321   : > { %881 = vsyncadd (!%p769_p3), %s588_s30, 4294967168  ;;  %s20_s29 = sadd.s32 1, %s904_s29   ;;  %s1126_s24 = smov %s888_s25 }
 0x322   : > { %p17_p5 = scmp.ge.s32.totalorder %s20_s29, 4   ;;  %s1127_s25 = smov %s892_s26 }
 0x323   : > { %s1128_s26 = smov %s1003_s14  ;;  %s1129_s27 = smov %s900_s28 }
 0x324   : > { %s1130_s28 = smov %s1132_s9  ;;  %19 = sbr.rel (!%p17_p5) target bundleno = 4 (0x4), region = 100 }
 0x32b   :  { %593 = vsyncpa [#allocation4], 1 }
 0x32c   :  { %595 = vsyncpa [#allocation4 + $0x1], 1 }

// kernel: transformer_decoder_forward.23
= control target key start
LH: loop header
LB: loop body
LE: loop exit
PB: predicated region body
PF: predicated region fallthrough
CT: control target
= control target key end

     0   :  { %s841_s24 = smov 0   ;;  %s843_s25 = smov 0   ;;  %s939_s0 = inlined_call_operand.vmem [shape: f32[16,32], index: 0, kind: input, shape index: {}]   ;;  %s940_s1 = inlined_call_operand.vmem [shape: f32[32,64], index: 1, kind: input, shape index: {}]   ;;  %s941_s2 = inlined_call_operand.vmem [shape: f32[1,64], index: 2, kind: input, shape index: {}]   ;;  %s942_s3 = inlined_call_operand.vmem [shape: f32[64,32], index: 3, kind: input, shape index: {}]   ;;  %s943_s4 = inlined_call_operand.vmem [shape: f32[1,32], index: 4, kind: input, shape index: {}]   ;;  %s944_s5 = inlined_call_operand.vmem [shape: f32[1,32], index: 5, kind: input, shape index: {}]   ;;  %s945_s6 = inlined_call_operand.vmem [shape: f32[1,32], index: 6, kind: input, shape index: {}]   ;;  %s946_s7 = inlined_call_operand.vmem [shape: f32[16,32], index: 7, kind: output, shape index: {}]  }
   0x1   :  { %s845_s26 = smov 0  }
   0x2 LB: > { %s29_s27 = sadd.s32 1, %s792_s25  ;;  %p672_p0 = scmp.ge.s32.totalorder %s796_s26, 1  ;;  %s796_s26 = sphi %s845_s26, %s17_s26   ;;  %s792_s25 = sphi %s843_s25, %s948_s25   ;;  %s788_s24 = sphi %s841_s24, %s947_s24  }
   0x3   : > { %p31_p1 = scmp.ge.s32.totalorder %s29_s27, 2  ;;  %p276_p2 = scmp.lt.s32.totalorder %s796_s26, 3 }
   0x5   : > { %s950_s27 = smov (%p31_p1, %s29_s27), 0  ;;  %p277_p3 = pnand %p672_p0, %p276_p2 }
   0x6   : > { %v346_v0 = vld [vmem:[%s940_s1] sm:$0xff] (!%p277_p3)  ;;  %v347_v1 = vld [vmem:[%s940_s1 + $0x8] sm:$0xff] (!%p277_p3)  ;;  %v348_v2 = vld [vmem:[%s940_s1 + $0x10] sm:$0xff] (!%p277_p3)  ;;  %vm343_vm0 = vcmask (!%p277_p3), 261120   ;;  %v798_v3 = vmov (!%p277_p3), 0.0|0.0   ;;  %v799_v6 = vmov (!%p277_p3), 0.0  }
   0x7   : > { %280 = sbr.rel (%p277_p3) target bundleno = 774 (0x306), region = 48  ;;  %727 = vmatprep.subr.bf16.mxu0 (!%p277_p3), %v798_v3  ;;  %v728_v4 = vpack.c.bf16 (!%p277_p3), %v347_v1, %v346_v0  ;;  %v349_v5 = vld [vmem:[%s940_s1 + $0x18] sm:$0xff] (!%p277_p3)  ;;  %344 = vst.msk [vmem:[#allocation2] sm:$0xff] (!%p277_p3), %vm343_vm0, %v799_v6  ;;  %p318_p4 = scmp.lt.s32.totalorder (!%p277_p3), %s788_s24, 1  ;;  %733 = vmatprep.subr.bf16.mxu1 (!%p277_p3), %v798_v3  ;;  %v433_v7 = vld [vmem:[%s942_s3] sm:$0xff] (!%p277_p3)  ;;  %v434_v8 = vld [vmem:[%s942_s3 + $0x8] sm:$0xff] (!%p277_p3) }
   0x8   : > { %vm800_vm1 = vmmov (!%p277_p3), 0   ;;  %v734_v9 = vpack.c.bf16 (!%p277_p3), %v434_v8, %v433_v7  ;;  %v435_v10 = vld [vmem:[%s942_s3 + $0x10] sm:$0xff] (!%p277_p3)  ;;  %v436_v11 = vld [vmem:[%s942_s3 + $0x18] sm:$0xff] (!%p277_p3)  ;;  %v731_v12 = vpack.c.bf16 (!%p277_p3), %v349_v5, %v348_v2  ;;  %v437_v14 = vld [vmem:[%s942_s3 + $0x20] sm:$0xff] (!%p277_p3)  ;;  %vm441_vm2 = vcmask (!%p277_p3), 523264  }
   0x9   : > { %705 = vmatprep.mubr.msk.f32.mxu0 (!%p277_p3), %vm800_vm1, %v799_v6  ;;  %724 = vmatprep.mubr.msk.f32.mxu1 (!%p277_p3), %vm800_vm1, %v799_v6  ;;  %v737_v13 = vpack.c.bf16 (!%p277_p3), %v436_v11, %v435_v10  ;;  %v438_v15 = vld [vmem:[%s942_s3 + $0x28] sm:$0xff] (!%p277_p3)  ;;  %v439_v18 = vld [vmem:[%s942_s3 + $0x30] sm:$0xff] (!%p277_p3)  ;;  %v440_v19 = vld [vmem:[%s942_s3 + $0x38] sm:$0xff] (!%p277_p3) }
   0xa   : > { %729 = vmatpush3.bf16.msra.mxu0 (!%p277_p3), %v728_v4  ;;  %735 = vmatpush3.bf16.msra.mxu1 (!%p277_p3), %v734_v9  ;;  %v740_v17 = vpack.c.bf16 (!%p277_p3), %v438_v15, %v437_v14  ;;  %v743_v20 = vpack.c.bf16 (!%p277_p3), %v440_v19, %v439_v18  ;;  %v675_v21 = vld [vmem:[%s941_s2] ss:$0 sm:$0xff] (!%p277_p3) }
   0xb   : > { %730 = vmatprep.subr.bf16.mxu0 (!%p277_p3), %v798_v3  ;;  %736 = vmatprep.subr.bf16.mxu1 (!%p277_p3), %v798_v3  ;;  %v678_v30 = vld [vmem:[%s943_s4] ss:$0 sm:$0xff] (!%p277_p3) }
   0xc   : > { %v679_v44 = vld [vmem:[%s944_s5] ss:$0 sm:$0xff] (!%p277_p3) }
   0xd   : > { %v680_v46 = vld [vmem:[%s945_s6] ss:$0 sm:$0xff] (!%p277_p3) }
   0xe   : > { %s952_s24 = smov (!%p318_p4, %s788_s24), 1  ;;  %732 = vmatpush3.bf16.msra.mxu0 %v731_v12  ;;  %738 = vmatpush3.bf16.msra.mxu1 %v737_v13  ;;  %v432_v26 = vld [vmem:[#allocation2] sm:$0xff] }
   0xf   : > { %s673_s21 = sshll.u32 %s952_s24, 3  ;;  %739 = vmatprep.subr.bf16.mxu1 %v798_v3 }
  0x10   : > { %s321_s9 = scalar_lea.vmem %s939_s0, %s673_s21  ;;  %s338_s29 = scalar_lea.vmem %s946_s7, %s673_s21 }
  0x11   : > { %v345_v16 = vld [vmem:[%s321_s9] sm:$0xff] }
  0x12   : > { %706 = vmatmul.mubr.msk.f32.vlgmr.msra.gmra.mrb[0].mxu0 %vm343_vm0, %v345_v16  ;;  %741 = vmatpush3.bf16.msra.mxu1 %v740_v17 }
  0x13   : > { %742 = vmatprep.subr.bf16.mxu1 %v798_v3 }
  0x16   : > { %744 = vmatpush3.bf16.msra.mxu1 %v743_v20 }
  0xe5   : > { %v427_v22 = vpop.f32.mrb[0].mxu0 }
  0xe6   : > { %v428_v23 = vadd.f32 %v675_v21, %v427_v22  ;;  %v707_v24 = vpop.f32.mrb[1].mxu0 }
  0xe8   : > { %v431_v25 = vmax.f32 %v428_v23, 0.0 }
  0xea   : > { %725 = vmatmul.mubr.msk.f32.vlgmr.msra.gmra.mrb[0].mxu1 %vm441_vm2, %v431_v25 }
 0x1bd   : > { %v511_v27 = vpop.f32.mrb[0].mxu1 }
 0x1be   : > { %v515_v28 = vadd.f32 %v511_v27, %v432_v26  ;;  %v726_v29 = vpop.f32.mrb[1].mxu1 }
 0x1c0   : > { %516 = vst.msk [vmem:[#allocation2] sm:$0xff] %vm343_vm0, %v515_v28 }
 0x1c7   : > { %v520_v31 = vld [vmem:[#allocation2] sm:$0xff] }
 0x1c8   : > { %v528_v32 = vadd.f32 %v678_v30, %v520_v31 }
 0x1ca   : > { %v529_v33 = vadd.f32 %v528_v32, %v345_v16 }
 0x1cc   : > { %v530_v34 = vsel %vm343_vm0, %v529_v33, 0.0 }
 0x1cd   : > { %531 = vadd.xlane.f32.xlu0 %v530_v34 }
 0x25a   : > { %v532_v35 = vpop.xlane.xlu0 %531 }
 0x25b   : > { %v534_v36 = vmul.f32 0.03125, %v532_v35 }
 0x25d   : > { %v535_v37 = vsub.f32 %v529_v33, %v534_v36 }
 0x25f   : > { %v536_v38 = vmul.f32 %v535_v37, %v535_v37 }
 0x261   : > { %v537_v39 = vsel %vm343_vm0, %v536_v38, 0.0 }
 0x262   : > { %538 = vadd.xlane.f32.xlu0 %v537_v39 }
 0x2ef   : > { %v539_v40 = vpop.xlane.xlu0 %538 }
 0x2f0   : > { %v540_v41 = vmul.f32 0.03125, %v539_v40 }
 0x2f2   : > { %v541_v42 = vadd.f32 1e-05, %v540_v41 }
 0x2f4   : > { %772 = vrsqrt.f32 %v541_v42 }
 0x2fe   : > { %v773_v43 = vpop.eup %772 }
 0x2ff   : > { %v543_v45 = vmul.f32 %v773_v43, %v535_v37 }
 0x301   : > { %v551_v47 = vmul.f32 %v679_v44, %v543_v45 }
 0x303   : > { %v559_v48 = vadd.f32 %v680_v46, %v551_v47 }
 0x305   : > { %560 = vst.msk [vmem:[%s338_s29] sm:$0xff] %vm343_vm0, %v559_v48 }
 0x306 PF: > { %s17_s26 = sadd.s32 1, %s796_s26   ;;  %s947_s24 = smov %s792_s25 }
 0x307   : > { %p14_p5 = scmp.ge.s32.totalorder %s17_s26, 4   ;;  %s948_s25 = smov %s950_s27 }
 0x309   :  { %16 = sbr.rel (!%p14_p5) target bundleno = 2 (0x2), region = 95 }

// kernel: transformer_decoder_forward.21
= control target key start
LH: loop header
LB: loop body
LE: loop exit
PB: predicated region body
PF: predicated region fallthrough
CT: control target
= control target key end

     0   :  { %s1051_s9 = smov 0   ;;  %s1137_s0 = inlined_call_operand.vmem [shape: f32[2,8,32], index: 0, kind: input, shape index: {}]   ;;  %s1138_s1 = inlined_call_operand.vmem [shape: f32[2,8,64], index: 1, kind: input, shape index: {}]   ;;  %s1139_s2 = inlined_call_operand.vmem [shape: f32[2,8,32], index: 2, kind: output, shape index: {}]  }
   0x1 LB: > { %s902_s10 = sadd.s32 4294967295, %s1022_s9   ;;  %p906_p0 = scmp.ge.s32.totalorder %s1022_s9, 1  ;;  %s1022_s9 = sphi %s1051_s9, %s12_s9  }
   0x2   : > { %p120_p1 = scmp.lt.s32.totalorder %s1022_s9, 3 }
   0x4   : > { %p121_p2 = pnand %p906_p0, %p120_p1 }
   0x5   : > { %p144_p3 = scmp.lt.s32.totalorder (!%p121_p2), %s902_s10, 1  ;;  %v1024_v0 = vmov (!%p121_p2), 0.0   ;;  %vm1025_vm0 = vmmov (!%p121_p2), 0   ;;  %vm159_vm1 = vcmask (!%p121_p2), 64512   ;;  %s1026_s18 = smov (!%p121_p2), 120   ;;  %vm493_vm2 = vcmask (!%p121_p2), 130112  }
   0x6   : > { %124 = sbr.rel (%p121_p2) target bundleno = 1102 (0x44e), region = 28  ;;  %940 = vmatprep.subr.mxu0 (!%p121_p2), %v1024_v0  ;;  %942 = vmatprep.mubr.msk.f32.mxu0 (!%p121_p2), %vm1025_vm0, %v1024_v0  ;;  %s1027_s19 = smov (!%p121_p2), 112   ;;  %vm664_vm3 = vcmask (!%p121_p2), 195712   ;;  %vm835_vm4 = vcmask (!%p121_p2), 261312  }
   0x7   : > { %945 = vmatprep.subr.mxu1 (!%p121_p2), %v1024_v0  ;;  %947 = vmatprep.mubr.msk.f32.mxu1 (!%p121_p2), %vm1025_vm0, %v1024_v0  ;;  %s1028_s20 = smov (!%p121_p2), 104   ;;  %s1029_s21 = smov (!%p121_p2), 96  }
   0x8   : > { %s1030_s22 = smov (!%p121_p2), 88   ;;  %s1031_s23 = smov (!%p121_p2), 72  }
   0x9   : > { %s1032_s24 = smov (!%p121_p2), 80   ;;  %s1033_s28 = smov (!%p121_p2), 8  }
   0xa   : > { %s1034_s29 = smov (!%p121_p2), 16   ;;  %s1035_s30 = smov (!%p121_p2), 24  }
   0xd   : > { %s1141_s10 = smov (!%p144_p3, %s902_s10), 1 }
   0xe   : > { %s1065_s11 = sshll.u32 %s1141_s10, 3 }
   0xf   : > { %s151_s14 = scalar_lea.vmem %s1138_s1, %s1065_s11  ;;  %s147_s17 = scalar_lea.vmem %s1137_s0, %s1065_s11 }
  0x10   : > { %v1075_v1 = vld [vmem:[%s151_s14] sm:$0xff]  ;;  %s1127_s27 = scalar_lea.vmem %s1139_s2, %s1065_s11 }
  0x11   : > { %v156_v2 = vld [vmem:[%s147_s17] sm:$0xff]  ;;  %941 = vmatpush3.xpose.msk.msra.mxu0 %vm159_vm1, %v1075_v1  ;;  %326 = vrot.lane.b32.xlu1 %v1075_v1, %s1026_s18 }
  0x12   : > { %v158_v3 = vmul.f32 0.35355338, %v156_v2  ;;  %955 = vmatprep.subr.mxu0 %v1024_v0 }
  0x14   : > { %943 = vmatmul.mubr.msk.f32.vlgmr.msra.gmra.mrb[0].mxu0 %vm159_vm1, %v158_v3 }
  0x15   : > { %957 = vmatprep.mubr.msk.f32.mxu0 %vm1025_vm0, %v1024_v0  ;;  %324 = vrot.lane.b32.xlu1 %v158_v3, %s1026_s18 }
  0x19   : > { %497 = vrot.lane.b32.xlu1 %v1075_v1, %s1027_s19 }
  0x1d   : > { %495 = vrot.lane.b32.xlu1 %v158_v3, %s1027_s19 }
  0x21   : > { %668 = vrot.lane.b32.xlu1 %v1075_v1, %s1028_s20 }
  0x25   : > { %666 = vrot.lane.b32.xlu1 %v158_v3, %s1028_s20 }
  0x29   : > { %411 = vrot.lane.b32.xlu1 %v1075_v1, %s1030_s22 }
  0x83   : > { %v327_v7 = vpop.permute.xlu1 %326 }
  0x87   : > { %v325_v10 = vpop.permute.xlu1 %324 }
  0x8b   : > { %v498_v13 = vpop.permute.xlu1 %497 }
  0x8f   : > { %v496_v14 = vpop.permute.xlu1 %495 }
  0x93   : > { %v669_v16 = vpop.permute.xlu1 %668 }
  0x97   : > { %v667_v17 = vpop.permute.xlu1 %666 }
  0x9b   : > { %v412_v18 = vpop.permute.xlu1 %411 }
  0x9c   : > { %956 = vmatpush3.msra.mxu0 %v412_v18 }
  0x9d   : > { %965 = vmatprep.subr.mxu0 %v1024_v0 }
  0xe7   : > { %v232_v4 = vpop.f32.mrb[0].mxu0 }
  0xe8   : > { %v944_v5 = vpop.f32.mrb[1].mxu0  ;;  %v236_v6 = vsel %vm159_vm1, %v232_v4, -inf }
  0xe9   : > { %237 = vmax.xlane.f32.xlu0 %v236_v6 }
  0xff   : > { %245 = vrot.lane.b32.xlu0 %v1075_v1, %s1029_s21 }
 0x176   : > { %v238_v8 = vpop.xlane.xlu0 %237 }
 0x177   : > { %v239_v9 = vsub.f32 %v232_v4, %v238_v8 }
 0x179   : > { %v240_v11 = vmul.f32 1.442695, %v239_v9 }
 0x17a   : > { %v246_v12 = vpop.permute.xlu0 %245 }
 0x17b   : > { %1000 = vpow2.f32 %v240_v11  ;;  %946 = vmatpush3.msra.mxu1 %v246_v12 }
 0x17c   : > { %950 = vmatprep.subr.mxu1 %v1024_v0 }
 0x185   : > { %v1001_v15 = vpop.eup %1000 }
 0x186   : > { %948 = vmatmul.mubr.msk.f32.vlgmr.msra.gmra.mrb[0].mxu1 %vm159_vm1, %v1001_v15  ;;  %v242_v44 = vsel %vm159_vm1, %v1001_v15, 0.0 }
 0x187   : > { %951 = vmatpush3.xpose.msk.msra.mxu1 %vm159_vm1, %v327_v7  ;;  %952 = vmatprep.mubr.msk.f32.mxu1 %vm1025_vm0, %v1024_v0 }
 0x188   : > { %960 = vmatprep.subr.mxu1 %v1024_v0 }
 0x18a   : > { %953 = vmatmul.mubr.msk.f32.vlgmr.msra.gmra.mrb[2].mxu1 %vm159_vm1, %v325_v10 }
 0x18b   : > { %961 = vmatpush3.xpose.msk.msra.mxu1 %vm159_vm1, %v498_v13  ;;  %962 = vmatprep.mubr.msk.f32.mxu1 %vm1025_vm0, %v1024_v0 }
 0x18c   : > { %970 = vmatprep.subr.mxu1 %v1024_v0 }
 0x18e   : > { %963 = vmatmul.mubr.msk.f32.vlgmr.msra.gmra.mrb[4].mxu1 %vm159_vm1, %v496_v14 }
 0x18f   : > { %971 = vmatpush3.xpose.msk.msra.mxu1 %vm159_vm1, %v669_v16  ;;  %972 = vmatprep.mubr.msk.f32.mxu1 %vm1025_vm0, %v1024_v0 }
 0x192   : > { %973 = vmatmul.mubr.msk.f32.vlgmr.msra.gmra.mrb[6].mxu1 %vm159_vm1, %v667_v17 }
 0x259   : > { %v317_v19 = vpop.f32.mrb[0].mxu1 }
 0x25a   : > { %v949_v20 = vpop.f32.mrb[1].mxu1 }
 0x25d   : > { %v398_v21 = vpop.f32.mrb[2].mxu1 }
 0x25e   : > { %v954_v22 = vpop.f32.mrb[3].mxu1  ;;  %v402_v23 = vsel %vm159_vm1, %v398_v21, -inf }
 0x25f   : > { %403 = vmax.xlane.f32.xlu1 %v402_v23 }
 0x261   : > { %v569_v24 = vpop.f32.mrb[4].mxu1 }
 0x262   : > { %v964_v25 = vpop.f32.mrb[5].mxu1  ;;  %v573_v26 = vsel %vm159_vm1, %v569_v24, -inf }
 0x263   : > { %574 = vmax.xlane.f32.xlu0 %v573_v26 }
 0x265   : > { %v740_v27 = vpop.f32.mrb[6].mxu1 }
 0x266   : > { %v974_v28 = vpop.f32.mrb[7].mxu1  ;;  %v744_v29 = vsel %vm159_vm1, %v740_v27, -inf }
 0x267   : > { %745 = vmax.xlane.f32.xlu0 %v744_v29 }
 0x270   : > { %753 = vrot.lane.b32.xlu1 %v1075_v1, %s1031_s23 }
 0x27d   : > { %582 = vrot.lane.b32.xlu0 %v1075_v1, %s1032_s24 }
 0x2ec   : > { %v404_v30 = vpop.xlane.xlu1 %403 }
 0x2ed   : > { %v405_v31 = vsub.f32 %v398_v21, %v404_v30 }
 0x2ef   : > { %v406_v32 = vmul.f32 1.442695, %v405_v31 }
 0x2f0   : > { %v575_v33 = vpop.xlane.xlu0 %574  ;;  %v754_v42 = vpop.permute.xlu1 %753 }
 0x2f1   : > { %1002 = vpow2.f32 %v406_v32  ;;  %v576_v34 = vsub.f32 %v569_v24, %v575_v33 }
 0x2f3   : > { %v577_v35 = vmul.f32 1.442695, %v576_v34 }
 0x2f4   : > { %v746_v36 = vpop.xlane.xlu0 %745 }
 0x2f5   : > { %1004 = vpow2.f32 %v577_v35  ;;  %v747_v37 = vsub.f32 %v740_v27, %v746_v36 }
 0x2f7   : > { %v748_v38 = vmul.f32 1.442695, %v747_v37 }
 0x2f8   : > { %v583_v39 = vpop.permute.xlu0 %582 }
 0x2f9   : > { %1006 = vpow2.f32 %v748_v38 }
 0x2fb   : > { %v1003_v40 = vpop.eup %1002 }
 0x2fc   : > { %958 = vmatmul.mubr.msk.f32.vlgmr.msra.gmra.mrb[2].mxu0 %vm159_vm1, %v1003_v40  ;;  %v408_v41 = vsel %vm159_vm1, %v1003_v40, 0.0 }
 0x2fd   : > { %966 = vmatpush3.msra.mxu0 %v583_v39  ;;  %409 = vadd.xlane.f32.xlu1 %v408_v41 }
 0x2fe   : > { %967 = vmatprep.mubr.msk.f32.mxu0 %vm1025_vm0, %v1024_v0  ;;  %975 = vmatprep.subr.mxu0 %v1024_v0 }
 0x2ff   : > { %v1005_v43 = vpop.eup %1004 }
 0x300   : > { %968 = vmatmul.mubr.msk.f32.vlgmr.msra.gmra.mrb[4].mxu0 %vm159_vm1, %v1005_v43  ;;  %v579_v45 = vsel %vm159_vm1, %v1005_v43, 0.0 }
 0x301   : > { %976 = vmatpush3.msra.mxu0 %v754_v42  ;;  %243 = vadd.xlane.f32.xlu1 %v242_v44 }
 0x302   : > { %580 = vadd.xlane.f32.xlu0 %v579_v45  ;;  %977 = vmatprep.mubr.msk.f32.mxu0 %vm1025_vm0, %v1024_v0 }
 0x303   : > { %v1007_v46 = vpop.eup %1006 }
 0x304   : > { %978 = vmatmul.mubr.msk.f32.vlgmr.msra.gmra.mrb[6].mxu0 %vm159_vm1, %v1007_v46  ;;  %v750_v47 = vsel %vm159_vm1, %v1007_v46, 0.0 }
 0x306   : > { %751 = vadd.xlane.f32.xlu0 %v750_v47 }
 0x38a   : > { %v410_v48 = vpop.xlane.xlu1 %409 }
 0x38e   : > { %v244_v49 = vpop.xlane.xlu1 %243 }
 0x38f   : > { %1008 = vrcp.f32 %v244_v49  ;;  %v581_v52 = vpop.xlane.xlu0 %580 }
 0x390   : > { %1010 = vrcp.f32 %v410_v48 }
 0x391   : > { %1012 = vrcp.f32 %v581_v52 }
 0x393   : > { %v752_v53 = vpop.xlane.xlu0 %751 }
 0x394   : > { %1014 = vrcp.f32 %v752_v53 }
 0x399   : > { %v1009_v50 = vpop.eup %1008 }
 0x39a   : > { %v322_v51 = vmul.f32 %v1009_v50, %v317_v19  ;;  %v1011_v54 = vpop.eup %1010 }
 0x39b   : > { %v1013_v58 = vpop.eup %1012 }
 0x39c   : > { %323 = vst.msk [vmem:[%s1127_s27] sm:$0xff] %vm159_vm1, %v322_v51 }
 0x39e   : > { %v1015_v62 = vpop.eup %1014 }
 0x3cf   : > { %v483_v55 = vpop.f32.mrb[2].mxu0 }
 0x3d0   : > { %v488_v56 = vmul.f32 %v1011_v54, %v483_v55  ;;  %v959_v57 = vpop.f32.mrb[3].mxu0 }
 0x3d2   : > { %490 = vrot.lane.b32.xlu0 %v488_v56, %s1033_s28 }
 0x3d3   : > { %v654_v59 = vpop.f32.mrb[4].mxu0 }
 0x3d4   : > { %v659_v60 = vmul.f32 %v1013_v58, %v654_v59  ;;  %v969_v61 = vpop.f32.mrb[5].mxu0 }
 0x3d6   : > { %661 = vrot.lane.b32.xlu1 %v659_v60, %s1034_s29 }
 0x3d7   : > { %v825_v63 = vpop.f32.mrb[6].mxu0 }
 0x3d8   : > { %v830_v0 = vmul.f32 %v1015_v62, %v825_v63  ;;  %v979_v1 = vpop.f32.mrb[7].mxu0 }
 0x3da   : > { %832 = vrot.lane.b32.xlu1 %v830_v0, %s1035_s30 }
 0x444   : > { %v491_v2 = vpop.permute.xlu0 %490 }
 0x445   : > { %494 = vst.msk [vmem:[%s1127_s27] sm:$0xff] %vm493_vm2, %v491_v2 }
 0x448   : > { %v662_v3 = vpop.permute.xlu1 %661 }
 0x449   : > { %665 = vst.msk [vmem:[%s1127_s27] sm:$0xff] %vm664_vm3, %v662_v3 }
 0x44c   : > { %v833_v4 = vpop.permute.xlu1 %832 }
 0x44d   : > { %836 = vst.msk [vmem:[%s1127_s27] sm:$0xff] %vm835_vm4, %v833_v4 }
 0x44e PF: > { %s12_s9 = sadd.s32 1, %s1022_s9  }
 0x44f   : > { %p9_p4 = scmp.ge.s32.totalorder %s12_s9, 4  }
 0x451   :  { %11 = sbr.rel (!%p9_p4) target bundleno = 1 (0x1), region = 61 }

</bundles_post_ra>
